<compile_context>
chip_gen: v6e
topology: v6e:2x2x1
jax: 0.10.0
libtpu: 0.0.40
codegen_flags: <defaults>
</compile_context>

<pallas_src>
import jax
import jax.numpy as jnp
from jax.experimental import pallas as pl
from jax.experimental.pallas import tpu as pltpu

D_IN, D_H1, D_H2 = 768, 512, 256
# lax.dot_general dimension numbers for A @ B.T ("NT" matmul, as in flash attn).
NT_DIMS = (((1,), (1,)), ((), ()))


def _round_up(n, m):
    return ((n + m - 1) // m) * m


def mlp_kernel(x_ref, w1_ref, b1_ref, w2_ref, b2_ref, w3_ref, b3_ref, o_ref):
    # x_ref : (TB, 768)  f32    batch tile (cast to bf16 in-kernel)
    # w1_ref: (768, 512) bf16   b1_ref: (1, 512) f32
    # w2_ref: (512, 256) bf16   b2_ref: (1, 256) f32
    # w3_ref: (8, 256)   f32    row 0 = fc3 weights, rows 1..7 zero padding
    # b3_ref: (1, 1)     f32    SMEM scalar
    # o_ref : (1, TB)    f32    lane-dense output row for this tile
    x = x_ref[...].astype(jnp.bfloat16)          # in-kernel cast (VPU, free)
    h1 = jnp.dot(x, w1_ref[...], preferred_element_type=jnp.float32)
    h1 = jnp.maximum(h1 + b1_ref[...], 0.0)

    h2 = jnp.dot(h1.astype(jnp.bfloat16), w2_ref[...],
                 preferred_element_type=jnp.float32)
    h2 = jnp.maximum(h2 + b2_ref[...], 0.0)

    # Layer 3: (8,256) @ (TB,256)^T -> (8,TB) so the TB batch results come out
    # lane-dense; keep the real row 0. f32 x f32 (tiny amount of MXU work).
    logits = jax.lax.dot_general(w3_ref[...], h2, NT_DIMS,
                                 preferred_element_type=jnp.float32)
    logits = logits[0:1, :] + b3_ref[0, 0]
    o_ref[...] = jax.nn.sigmoid(logits)


def prepare_params(w1, b1, w2, b2, w3, b3):
    """One-time conversion of the f32 parameters into kernel layout/dtypes."""
    return dict(
        w1=w1.astype(jnp.bfloat16),                              # (768, 512)
        b1=jnp.reshape(b1, (1, D_H1)).astype(jnp.float32),
        w2=w2.astype(jnp.bfloat16),                              # (512, 256)
        b2=jnp.reshape(b2, (1, D_H2)).astype(jnp.float32),
        # fc3 stays f32 (negligible cost, better sigmoid numerics); pad to 8
        # sublanes so the (8,256) NT dot is layout-legal.
        w3=jnp.pad(jnp.reshape(w3, (1, D_H2)).astype(jnp.float32),
                   ((0, 7), (0, 0))),                            # (8, 256)
        b3=jnp.reshape(b3, (1, 1)).astype(jnp.float32),
    )


def reasoning_net(x, params, *, tb_max=2048):
    """x: (B, 768) float32, params from prepare_params. Returns (B, 1) f32.

    tb_max: batch-tile cap. 2048 is a good default for v6e/v7x; use 1024 on
    v5e (slower MXU already amortizes per-step overhead; smaller VMEM budget).
    """
    B = x.shape[0]
    x = x.astype(jnp.float32)

    # Tile: >=128 (lane-dense output row), multiple of 128, and for large B at
    # least 2 grid steps so v7x's second TensorCore is not idle.
    tb_cap = max(128, _round_up(tb_max, 128))
    TB = max(128, min(tb_cap, _round_up(pl.cdiv(B, 2), 128)))
    padded_B = _round_up(B, TB)
    G = padded_B // TB
    if padded_B != B:
        x = jnp.pad(x, ((0, padded_B - B), (0, 0)))

    # Weights/biases: full-array blocks with constant index_map -> VMEM-resident
    # (Pallas skips re-DMA when the block index does not change).
    def resident(a):
        nd = a.ndim
        return pl.BlockSpec(a.shape, lambda i, nd=nd: (0,) * nd)

    flops = 2 * padded_B * (D_IN * D_H1 + D_H1 * D_H2 + D_H2)
    bytes_accessed = (padded_B * D_IN * 4                       # x (f32 read)
                      + params["w1"].size * 2 + params["w2"].size * 2
                      + params["w3"].size * 4
                      + (params["b1"].size + params["b2"].size
                         + params["b3"].size) * 4
                      + padded_B * 4)                           # output

    # VMEM budget: double-buffered f32 x tile + f32/bf16 intermediates + the
    # (double-buffered) resident weights + output rows.
    vmem_bytes = (2 * TB * D_IN * 4
                  + TB * (D_H1 * 4 + D_H1 * 2 + D_H2 * 4)
                  + 2 * ((D_IN * D_H1 + D_H1 * D_H2) * 2
                         + 8 * D_H2 * 4 + (D_H1 + D_H2) * 4)
                  + 2 * TB * 4)
    vmem_limit = min(56 << 20, max(32 << 20, int(vmem_bytes * 1.5)))

    out = pl.pallas_call(
        mlp_kernel,
        out_shape=jax.ShapeDtypeStruct((G, 1, TB), jnp.float32),
        grid=(G,),
        in_specs=[
            pl.BlockSpec((TB, D_IN), lambda i: (i, 0)),          # x (tiled)
            resident(params["w1"]), resident(params["b1"]),
            resident(params["w2"]), resident(params["b2"]),
            resident(params["w3"]),
            pl.BlockSpec(memory_space=pltpu.MemorySpace.SMEM),   # b3 scalar
        ],
        # Lane-dense output: one (1, TB) row per batch tile.
        out_specs=pl.BlockSpec((None, 1, TB), lambda i: (i, 0, 0)),
        compiler_params=pltpu.CompilerParams(
            dimension_semantics=("parallel",),
            vmem_limit_bytes=vmem_limit),
        cost_estimate=pl.CostEstimate(
            flops=flops, transcendentals=padded_B,
            bytes_accessed=bytes_accessed),
    )(x, params["w1"], params["b1"], params["w2"], params["b2"],
      params["w3"], params["b3"])

    return out.reshape(padded_B)[:B].reshape(B, 1)


def init_params(key):
    """Deterministic parameter init (Kaiming-uniform-ish, like nn.Linear)."""
    ks = jax.random.split(key, 6)

    def linear(kw, kb, fan_in, fan_out):
        bound = 1.0 / jnp.sqrt(fan_in)
        w = jax.random.uniform(kw, (fan_in, fan_out), jnp.float32, -bound, bound)
        b = jax.random.uniform(kb, (1, fan_out), jnp.float32, -bound, bound)
        return w, b

    w1, b1 = linear(ks[0], ks[1], D_IN, D_H1)
    w2, b2 = linear(ks[2], ks[3], D_H1, D_H2)
    w3, b3 = linear(ks[4], ks[5], D_H2, 1)
    return w1, b1, w2, b2, w3, b3


def reference(x, w1, b1, w2, b2, w3, b3):
    h1 = jax.nn.relu(x @ w1 + b1)
    h2 = jax.nn.relu(h1 @ w2 + b2)
    return jax.nn.sigmoid(h2 @ w3 + b3)


if __name__ == "__main__":
    key = jax.random.PRNGKey(0)
    k_params, k_x, k_x2 = jax.random.split(key, 3)
    raw_params = init_params(k_params)
    params = prepare_params(*raw_params)          # one-time layout/dtype prep

    # Small single-tile case.
    B = 8
    x = jax.random.normal(k_x, (B, D_IN), dtype=jnp.float32)
    out = jax.block_until_ready(reasoning_net(x, params))
    ref = reference(x, *raw_params)
    assert out.shape == (B, 1)
    # bf16 x/w1/w2 with f32 accumulation vs f32 reference -> loose tolerance.
    assert jnp.allclose(out, ref, atol=2e-2, rtol=0.0), "mismatch vs reference"

    # Multi-tile case exercising the batch grid, resident weights and padding.
    B2 = 300
    x2 = jax.random.normal(k_x2, (B2, D_IN), dtype=jnp.float32)
    out2 = jax.block_until_ready(reasoning_net(x2, params))
    ref2 = reference(x2, *raw_params)
    assert out2.shape == (B2, 1)
    assert jnp.allclose(out2, ref2, atol=2e-2, rtol=0.0), "mismatch vs reference"

    print("KERNEL_OK")
</pallas_src>

<mosaic_0001>
module attributes {stable_mosaic.version = 11 : i64} {
  func.func @mlp_kernel(%arg0: i32, %arg1: memref<128x768xf32, #tpu.memory_space<vmem>>, %arg2: memref<768x512xbf16, #tpu.memory_space<vmem>>, %arg3: memref<1x512xf32, #tpu.memory_space<vmem>>, %arg4: memref<512x256xbf16, #tpu.memory_space<vmem>>, %arg5: memref<1x256xf32, #tpu.memory_space<vmem>>, %arg6: memref<8x256xf32, #tpu.memory_space<vmem>>, %arg7: memref<1x1xf32, #tpu.memory_space<smem>>, %arg8: memref<1x1x128xf32, #tpu.memory_space<vmem>>) attributes {dimension_semantics = [#tpu.dimension_semantics<parallel>], iteration_bounds = array<i64: 1>, scalar_prefetch = 0 : i64, scratch_operands = 0 : i64, tpu.core_type = #tpu.core_type<tc>, window_params = [{transform_indices = @transform_0, window_bounds = array<i64: 128, 768>}, {pipeline_mode = #tpu.pipeline_mode<synchronous>, transform_indices = @transform_1, window_bounds = array<i64: 768, 512>}, {pipeline_mode = #tpu.pipeline_mode<synchronous>, transform_indices = @transform_2, window_bounds = array<i64: 1, 512>}, {pipeline_mode = #tpu.pipeline_mode<synchronous>, transform_indices = @transform_3, window_bounds = array<i64: 512, 256>}, {pipeline_mode = #tpu.pipeline_mode<synchronous>, transform_indices = @transform_4, window_bounds = array<i64: 1, 256>}, {pipeline_mode = #tpu.pipeline_mode<synchronous>, transform_indices = @transform_5, window_bounds = array<i64: 8, 256>}, {transform_indices = @transform_6, window_bounds = array<i64: 1, 1>}, {transform_indices = @transform_7, window_bounds = array<i64: 1, 1, 128>}]} {
    %c0 = arith.constant 0 : index
    %c0_0 = arith.constant 0 : index
    %0 = vector.load %arg1[%c0, %c0_0] : memref<128x768xf32, #tpu.memory_space<vmem>>, vector<128x768xf32>
    %1 = arith.truncf %0 : vector<128x768xf32> to vector<128x768xbf16>
    %c0_1 = arith.constant 0 : index
    %c0_2 = arith.constant 0 : index
    %2 = vector.load %arg2[%c0_1, %c0_2] : memref<768x512xbf16, #tpu.memory_space<vmem>>, vector<768x512xbf16>
    %cst = arith.constant dense<0.000000e+00> : vector<128x512xf32>
    %3 = tpu.matmul %1, %2, %cst {dimension_numbers = #tpu.dot_dimension_numbers<[1], [0], [0], [1], [0, 0, 1, 1], [], []>} : vector<128x768xbf16>, vector<768x512xbf16>, vector<128x512xf32> -> vector<128x512xf32>
    %c0_3 = arith.constant 0 : index
    %c0_4 = arith.constant 0 : index
    %4 = vector.load %arg3[%c0_3, %c0_4] : memref<1x512xf32, #tpu.memory_space<vmem>>, vector<1x512xf32>
    %5 = vector.broadcast %4 : vector<1x512xf32> to vector<128x512xf32>
    %6 = arith.addf %3, %5 : vector<128x512xf32>
    %cst_5 = arith.constant 0.000000e+00 : f32
    %7 = vector.broadcast %cst_5 : f32 to vector<128x512xf32>
    %8 = arith.maximumf %6, %7 : vector<128x512xf32>
    %9 = arith.truncf %8 : vector<128x512xf32> to vector<128x512xbf16>
    %c0_6 = arith.constant 0 : index
    %c0_7 = arith.constant 0 : index
    %10 = vector.load %arg4[%c0_6, %c0_7] : memref<512x256xbf16, #tpu.memory_space<vmem>>, vector<512x256xbf16>
    %cst_8 = arith.constant dense<0.000000e+00> : vector<128x256xf32>
    %11 = tpu.matmul %9, %10, %cst_8 {dimension_numbers = #tpu.dot_dimension_numbers<[1], [0], [0], [1], [0, 0, 1, 1], [], []>} : vector<128x512xbf16>, vector<512x256xbf16>, vector<128x256xf32> -> vector<128x256xf32>
    %c0_9 = arith.constant 0 : index
    %c0_10 = arith.constant 0 : index
    %12 = vector.load %arg5[%c0_9, %c0_10] : memref<1x256xf32, #tpu.memory_space<vmem>>, vector<1x256xf32>
    %13 = vector.broadcast %12 : vector<1x256xf32> to vector<128x256xf32>
    %14 = arith.addf %11, %13 : vector<128x256xf32>
    %cst_11 = arith.constant 0.000000e+00 : f32
    %15 = vector.broadcast %cst_11 : f32 to vector<128x256xf32>
    %16 = arith.maximumf %14, %15 : vector<128x256xf32>
    %c0_12 = arith.constant 0 : index
    %c0_13 = arith.constant 0 : index
    %17 = vector.load %arg6[%c0_12, %c0_13] : memref<8x256xf32, #tpu.memory_space<vmem>>, vector<8x256xf32>
    %cst_14 = arith.constant dense<0.000000e+00> : vector<8x128xf32>
    %18 = tpu.matmul %17, %16, %cst_14 {dimension_numbers = #tpu.dot_dimension_numbers<[1], [1], [0], [0], [0, 0, 1, 0], [], []>} : vector<8x256xf32>, vector<128x256xf32>, vector<8x128xf32> -> vector<8x128xf32>
    %19 = vector.extract_strided_slice %18 {offsets = [0, 0], sizes = [1, 128], strides = [1, 1]} : vector<8x128xf32> to vector<1x128xf32>
    %c0_15 = arith.constant 0 : index
    %c0_16 = arith.constant 0 : index
    %20 = memref.load %arg7[%c0_15, %c0_16] : memref<1x1xf32, #tpu.memory_space<smem>>
    %21 = vector.broadcast %20 : f32 to vector<1x128xf32>
    %22 = arith.addf %19, %21 : vector<1x128xf32>
    %23 = arith.negf %22 : vector<1x128xf32>
    %24 = math.exp %23 : vector<1x128xf32>
    %cst_17 = arith.constant 1.000000e+00 : f32
    %25 = vector.broadcast %cst_17 : f32 to vector<1x128xf32>
    %26 = arith.addf %25, %24 : vector<1x128xf32>
    %27 = arith.divf %25, %26 : vector<1x128xf32>
    %c0_18 = arith.constant 0 : index
    %c0_19 = arith.constant 0 : index
    %c0_20 = arith.constant 0 : index
    %28 = vector.load %arg8[%c0_18, %c0_19, %c0_20] : memref<1x1x128xf32, #tpu.memory_space<vmem>>, vector<1x1x128xf32>
    %29 = vector.shape_cast %28 : vector<1x1x128xf32> to vector<1x128xf32>
    %30 = vector.shape_cast %27 : vector<1x128xf32> to vector<1x1x128xf32>
    tpu.vector_store %arg8[%c0_18, %c0_19, %c0_20], %30 {strides = array<i32>} : memref<1x1x128xf32, #tpu.memory_space<vmem>>, vector<1x1x128xf32>,
    return
  }
  func.func @transform_0(%arg0: i32) -> (i32, i32) {
    %c0_i32 = arith.constant 0 : i32
    %c0_i32_0 = arith.constant 0 : i32
    return %arg0, %c0_i32 : i32, i32
  }
  func.func @transform_1(%arg0: i32) -> (i32, i32) {
    %c0_i32 = arith.constant 0 : i32
    %c0_i32_0 = arith.constant 0 : i32
    %c0_i32_1 = arith.constant 0 : i32
    return %c0_i32, %c0_i32_0 : i32, i32
  }
  func.func @transform_2(%arg0: i32) -> (i32, i32) {
    %c0_i32 = arith.constant 0 : i32
    %c0_i32_0 = arith.constant 0 : i32
    %c0_i32_1 = arith.constant 0 : i32
    return %c0_i32, %c0_i32_0 : i32, i32
  }
  func.func @transform_3(%arg0: i32) -> (i32, i32) {
    %c0_i32 = arith.constant 0 : i32
    %c0_i32_0 = arith.constant 0 : i32
    %c0_i32_1 = arith.constant 0 : i32
    return %c0_i32, %c0_i32_0 : i32, i32
  }
  func.func @transform_4(%arg0: i32) -> (i32, i32) {
    %c0_i32 = arith.constant 0 : i32
    %c0_i32_0 = arith.constant 0 : i32
    %c0_i32_1 = arith.constant 0 : i32
    return %c0_i32, %c0_i32_0 : i32, i32
  }
  func.func @transform_5(%arg0: i32) -> (i32, i32) {
    %c0_i32 = arith.constant 0 : i32
    %c0_i32_0 = arith.constant 0 : i32
    %c0_i32_1 = arith.constant 0 : i32
    return %c0_i32, %c0_i32_0 : i32, i32
  }
  func.func @transform_6(%arg0: i32) -> (i32, i32) {
    %c0_i32 = arith.constant 0 : i32
    %c0_i32_0 = arith.constant 0 : i32
    %c0_i32_1 = arith.constant 0 : i32
    return %c0_i32, %c0_i32_0 : i32, i32
  }
  func.func @transform_7(%arg0: i32) -> (i32, i32, i32) {
    %c0_i32 = arith.constant 0 : i32
    %c0_i32_0 = arith.constant 0 : i32
    %c0_i32_1 = arith.constant 0 : i32
    return %arg0, %c0_i32, %c0_i32_0 : i32, i32, i32
  }
}

</mosaic_0001>

<bundles_post_ra>
// kernel: tpu_custom_call.1
= control target key start
LH: loop header
LB: loop body
LE: loop exit
PB: predicated region body
PF: predicated region fallthrough
CT: control target
= control target key end

     0   :  { %13 = vsyncpa [#allocation4], 0  ;;  %s4409_s0 = inlined_call_operand.hbm [shape: f32[128,768], index: 0, kind: input, shape index: {}]   ;;  %s4410_s1 = inlined_call_operand.hbm [shape: bf16[768,512], index: 1, kind: input, shape index: {}]   ;;  %s4411_s2 = inlined_call_operand.vmem [shape: f32[1,512], index: 2, kind: input, shape index: {}]   ;;  %s4412_s3 = inlined_call_operand.hbm [shape: bf16[512,256], index: 3, kind: input, shape index: {}]   ;;  %s4413_s4 = inlined_call_operand.vmem [shape: f32[1,256], index: 4, kind: input, shape index: {}]   ;;  %s4414_s5 = inlined_call_operand.hbm [shape: f32[8,256], index: 5, kind: input, shape index: {}]   ;;  %s4415_s6 = inlined_call_operand.<no memory space> [shape: f32[1,1], index: 6, kind: input, shape index: {}]   ;;  %s4416_s7 = inlined_call_operand.hbm [shape: f32[1,1,128], index: 7, kind: output, shape index: {}]  }
   0x1   :  { %14 = vsyncpa [#allocation7], 0 }
   0x2   :  { %15 = vsyncpa [#allocation10], 0 }
   0x3   :  { %16 = vsyncpa [#allocation5], 0  ;;  %s3690_s24 = smov [#allocation6]  }
   0x4   :  { %s34_s25 = sshll.u32 %s3690_s24, 4  ;;  %s35_s25 = int_to_ptr.vmem [resolvable:$true] %s34_s25 }
   0x5   :  { %s3590_s26 = scalar_lea.vmem %s35_s25, 24576  ;;  %p3595_p1 = scmp.lt.s32.totalorder %s35_s25, %s35_s25 }
   0x6   :  { %p3591_p0 = scmp.ne.s32.totalorder %s35_s25, %s3590_s26  ;;  %p3596_p2 = scmp.lt.s32.totalorder %s3590_s26, %s3590_s26 }
   0x8   :  { %p3597_p3 = por %p3596_p2, %p3595_p1 }
   0xa   :  { %p3598_p4 = pnand %p3597_p3, %p3591_p0 }
   0xc   :  { %3601 = shalt.err (!%p3598_p4)
}
   0xd   :  { %s3691_s27 = smov 256   ;;  %s3692_s28 = smov 16  }
   0xe   :  { %40 = dma.hbm_to_vmem [thread:$0]  %s4410_s1, 24576, %s35_s25, [#allocation7], %s3691_s27, %s3691_s27, %s3692_s28  }
   0xf   :  { %s3693_s8 = smov [#allocation3]  }
  0x10   :  { %s22_s9 = sshll.u32 %s3693_s8, 4  ;;  %s23_s9 = int_to_ptr.vmem [resolvable:$true] %s22_s9 }
  0x11   :  { %s3610_s10 = scalar_lea.vmem %s23_s9, 12288  ;;  %p3615_p6 = scmp.lt.s32.totalorder %s23_s9, %s23_s9 }
  0x12   :  { %p3611_p5 = scmp.ne.s32.totalorder %s23_s9, %s3610_s10  ;;  %p3616_p7 = scmp.lt.s32.totalorder %s3610_s10, %s3610_s10 }
  0x14   :  { %p3617_p8 = por %p3616_p7, %p3615_p6 }
  0x16   :  { %p3618_p9 = pnand %p3617_p8, %p3611_p5 }
  0x18   :  { %3621 = shalt.err (!%p3618_p9)
}
  0x19   :  { %s3694_s11 = smov 768   ;;  %s3695_s12 = smov 48  }
  0x1a   :  { %28 = dma.hbm_to_vmem [thread:$0]  %s4409_s0, 12288, %s23_s9, [#allocation4], %s3694_s11, %s3694_s11, %s3695_s12  }
  0x1b   :  { %s3696_s15 = smov [#allocation8]  }
  0x1c   :  { %s48_s16 = sshll.u32 %s3696_s15, 4  ;;  %s49_s16 = int_to_ptr.vmem [resolvable:$true] %s48_s16 }
  0x1d   :  { %s3630_s1 = scalar_lea.vmem %s49_s16, 8192  ;;  %p3635_p11 = scmp.lt.s32.totalorder %s49_s16, %s49_s16 }
  0x1e   :  { %p3631_p10 = scmp.ne.s32.totalorder %s49_s16, %s3630_s1  ;;  %p3636_p12 = scmp.lt.s32.totalorder %s3630_s1, %s3630_s1 }
  0x20   :  { %p3637_p13 = por %p3636_p12, %p3635_p11 }
  0x22   :  { %p3638_p0 = pnand %p3637_p13, %p3631_p10 }
  0x24   :  { %3641 = shalt.err (!%p3638_p0)
}
  0x25   :  { %s3697_s17 = smov 128   ;;  %s3698_s18 = smov 8  }
  0x26   :  { %54 = dma.hbm_to_vmem [thread:$0]  %s4412_s3, 8192, %s49_s16, [#allocation7], %s3697_s17, %s3697_s17, %s3698_s18  }
  0x27   :  { %s3699_s21 = smov [#allocation9]  }
  0x28   :  { %s63_s22 = sshll.u32 %s3699_s21, 4  ;;  %s64_s22 = int_to_ptr.vmem [resolvable:$true] %s63_s22 }
  0x29   :  { %s3650_s0 = scalar_lea.vmem %s64_s22, 256  ;;  %p3655_p2 = scmp.lt.s32.totalorder %s64_s22, %s64_s22 }
  0x2a   :  { %p3651_p1 = scmp.ne.s32.totalorder %s64_s22, %s3650_s0  ;;  %p3656_p3 = scmp.lt.s32.totalorder %s3650_s0, %s3650_s0 }
  0x2c   :  { %p3657_p4 = por %p3656_p3, %p3655_p2 }
  0x2e   :  { %p3658_p5 = pnand %p3657_p4, %p3651_p1 }
  0x30   :  { %3661 = shalt.err (!%p3658_p5)
}
  0x31   :  { %66 = dma.hbm_to_vmem [thread:$0]  %s4414_s5, 256, %s64_s22, [#allocation10]  }
  0x32   :  { %3682 = dma.done.wait [#allocation4], 12288  }
  0x33   :  { %3683 = vsyncadd [#allocation4], 4294955008 }
  0x34   :  { %3684 = dma.done.wait [#allocation7], 32768  }
  0x35   :  { %3685 = vsyncadd [#allocation7], 4294934528 }
  0x36   :  { %3686 = dma.done.wait [#allocation10], 256  }
  0x37   :  { %3687 = vsyncadd [#allocation10], 4294967040  ;;  %v3194_v0 = vld [vmem:[#allocation6 + $0xe4] ss:$16 sps:$4 sm:$0xff]   ;;  %v3198_v2 = vld [vmem:[#allocation6 + $0xe0] ss:$16 sps:$4 sm:$0xff]  }
  0x38   :  { %v3196_v1 = vld [vmem:[#allocation6 + $0x2e4] ss:$16 sps:$4 sm:$0xff]   ;;  %1399 = vmatprep.subr.bf16.mxu0 %v3194_v0  ;;  %v3199_v3 = vld [vmem:[#allocation6 + $0x2e0] ss:$16 sps:$4 sm:$0xff]   ;;  %v82_v46 = vld [vmem:[#allocation3 + $0x8] sm:$0xff]  ;;  %s3700_s27 = smov [#allocation11]  }
  0x39   :  { %1512 = vmatprep.subr.bf16.mxu1 %v3196_v1  ;;  %v3200_v4 = vld [vmem:[#allocation6 + $0xc4] ss:$16 sps:$4 sm:$0xff]   ;;  %1400 = vmatpush1.bf16.msra.mxu0 %v3198_v2  ;;  %v3204_v6 = vld [vmem:[#allocation6 + $0xc0] ss:$16 sps:$4 sm:$0xff]   ;;  %v88_v47 = vld [vmem:[#allocation3 + $0x38] sm:$0xff]  ;;  %s2915_s28 = sshll.u32 %s3700_s27, 4  ;;  %s2916_s28 = int_to_ptr.vmem [resolvable:$true] %s2915_s28 }
  0x3a   :  { %1513 = vmatpush1.bf16.msra.mxu1 %v3199_v3  ;;  %v3202_v5 = vld [vmem:[#allocation6 + $0x2c4] ss:$16 sps:$4 sm:$0xff]   ;;  %1401 = vmatprep.subr.bf16.mxu0 %v3200_v4  ;;  %v3205_v7 = vld [vmem:[#allocation6 + $0x2c0] ss:$16 sps:$4 sm:$0xff]   ;;  %v84_v48 = vld [vmem:[#allocation3 + $0x18] sm:$0xff]  ;;  %v3753_v53 = vpack.c.bf16 %v88_v47, %v82_v46  ;;  %s3662_s29 = scalar_lea.vmem %s2916_s28, 16  ;;  %p3667_p7 = scmp.lt.s32.totalorder %s2916_s28, %s2916_s28 }
  0x3b   :  { %1514 = vmatprep.subr.bf16.mxu1 %v3202_v5  ;;  %v3206_v8 = vld [vmem:[#allocation6 + $0xa4] ss:$16 sps:$4 sm:$0xff]   ;;  %v3210_v10 = vld [vmem:[#allocation6 + $0xa0] ss:$16 sps:$4 sm:$0xff]   ;;  %v90_v49 = vld [vmem:[#allocation3 + $0x48] sm:$0xff]  ;;  %p3663_p6 = scmp.ne.s32.totalorder %s2916_s28, %s3662_s29  ;;  %s3666_s30 = scalar_lea.vmem %s2916_s28, 32 }
  0x3c   :  { %v3208_v9 = vld [vmem:[#allocation6 + $0x2a4] ss:$16 sps:$4 sm:$0xff]   ;;  %v3211_v11 = vld [vmem:[#allocation6 + $0x2a0] ss:$16 sps:$4 sm:$0xff]   ;;  %v3755_v54 = vpack.c.bf16 %v90_v49, %v84_v48  ;;  %1431 = vmatprep.mubr.bf16.mxu0 %v3753_v53  ;;  %p3668_p8 = scmp.lt.s32.totalorder %s3666_s30, %s3662_s29 }
  0x3d   :  { %1402 = vmatpush1.bf16.msra.mxu0 %v3204_v6  ;;  %v3212_v12 = vld [vmem:[#allocation6 + $0x84] ss:$16 sps:$4 sm:$0xff]   ;;  %v3216_v14 = vld [vmem:[#allocation6 + $0x80] ss:$16 sps:$4 sm:$0xff]  }
  0x3e   :  { %1515 = vmatpush1.bf16.msra.mxu1 %v3205_v7  ;;  %1403 = vmatprep.subr.bf16.mxu0 %v3206_v8  ;;  %v3214_v13 = vld [vmem:[#allocation6 + $0x284] ss:$16 sps:$4 sm:$0xff]   ;;  %v3217_v15 = vld [vmem:[#allocation6 + $0x280] ss:$16 sps:$4 sm:$0xff]   ;;  %p3669_p9 = por %p3668_p8, %p3667_p7 }
  0x3f   :  { %1516 = vmatprep.subr.bf16.mxu1 %v3208_v9  ;;  %v3218_v16 = vld [vmem:[#allocation6 + $0x64] ss:$16 sps:$4 sm:$0xff]   ;;  %v3222_v18 = vld [vmem:[#allocation6 + $0x60] ss:$16 sps:$4 sm:$0xff]   ;;  %1544 = vmatprep.mubr.bf16.mxu1 %v3755_v54 }
  0x40   :  { %v3220_v17 = vld [vmem:[#allocation6 + $0x264] ss:$16 sps:$4 sm:$0xff]   ;;  %v3223_v19 = vld [vmem:[#allocation6 + $0x260] ss:$16 sps:$4 sm:$0xff]   ;;  %p3670_p10 = pnand %p3669_p9, %p3663_p6 }
  0x41   :  { %1404 = vmatpush1.bf16.msra.mxu0 %v3210_v10  ;;  %v3224_v20 = vld [vmem:[#allocation6 + $0x44] ss:$16 sps:$4 sm:$0xff]   ;;  %v3228_v22 = vld [vmem:[#allocation6 + $0x40] ss:$16 sps:$4 sm:$0xff]  }
  0x42   :  { %1517 = vmatpush1.bf16.msra.mxu1 %v3211_v11  ;;  %1405 = vmatprep.subr.bf16.mxu0 %v3212_v12  ;;  %v3226_v21 = vld [vmem:[#allocation6 + $0x244] ss:$16 sps:$4 sm:$0xff]   ;;  %v3229_v23 = vld [vmem:[#allocation6 + $0x240] ss:$16 sps:$4 sm:$0xff]   ;;  %v3295_v11 = vld [vmem:[#allocation6 + $0xec] ss:$16 sps:$4 sm:$0xff]  }
  0x43   :  { %1518 = vmatprep.subr.bf16.mxu1 %v3214_v13  ;;  %v3230_v24 = vld [vmem:[#allocation6 + $0x24] ss:$16 sps:$4 sm:$0xff]   ;;  %v3234_v26 = vld [vmem:[#allocation6 + $0x20] ss:$16 sps:$4 sm:$0xff]   ;;  %v3293_v13 = vld [vmem:[#allocation6 + $0xe8] ss:$16 sps:$4 sm:$0xff]  }
  0x44   :  { %v3232_v25 = vld [vmem:[#allocation6 + $0x224] ss:$16 sps:$4 sm:$0xff]   ;;  %v3235_v27 = vld [vmem:[#allocation6 + $0x220] ss:$16 sps:$4 sm:$0xff]  }
  0x45   :  { %1406 = vmatpush1.bf16.msra.mxu0 %v3216_v14  ;;  %v3236_v28 = vld [vmem:[#allocation6 + $0x4] ss:$16 sps:$4 sm:$0xff]   ;;  %v3240_v30 = vld [vmem:[#allocation6] ss:$16 sps:$4 sm:$0xff]   ;;  %v94_v14 = vld [vmem:[#allocation3 + $0x68] sm:$0xff] }
  0x46   :  { %1519 = vmatpush1.bf16.msra.mxu1 %v3217_v15  ;;  %1407 = vmatprep.subr.bf16.mxu0 %v3218_v16  ;;  %v3238_v29 = vld [vmem:[#allocation6 + $0x204] ss:$16 sps:$4 sm:$0xff]   ;;  %v3241_v31 = vld [vmem:[#allocation6 + $0x200] ss:$16 sps:$4 sm:$0xff]   ;;  %v100_v15 = vld [vmem:[#allocation3 + $0x98] sm:$0xff] }
  0x47   :  { %1520 = vmatprep.subr.bf16.mxu1 %v3220_v17  ;;  %v3242_v32 = vld [vmem:[#allocation6 + $0x1e4] ss:$16 sps:$4 sm:$0xff]   ;;  %v3246_v34 = vld [vmem:[#allocation6 + $0x1e0] ss:$16 sps:$4 sm:$0xff]  }
  0x48   :  { %v3244_v33 = vld [vmem:[#allocation6 + $0x3e4] ss:$16 sps:$4 sm:$0xff]   ;;  %v3247_v35 = vld [vmem:[#allocation6 + $0x3e0] ss:$16 sps:$4 sm:$0xff]  }
  0x49   :  { %1408 = vmatpush1.bf16.msra.mxu0 %v3222_v18  ;;  %v3248_v36 = vld [vmem:[#allocation6 + $0x1c4] ss:$16 sps:$4 sm:$0xff]   ;;  %v3252_v38 = vld [vmem:[#allocation6 + $0x1c0] ss:$16 sps:$4 sm:$0xff]   ;;  %v96_v18 = vld [vmem:[#allocation3 + $0x78] sm:$0xff] }
  0x4a   :  { %1521 = vmatpush1.bf16.msra.mxu1 %v3223_v19  ;;  %1409 = vmatprep.subr.bf16.mxu0 %v3224_v20  ;;  %v3250_v37 = vld [vmem:[#allocation6 + $0x3c4] ss:$16 sps:$4 sm:$0xff]   ;;  %v3253_v39 = vld [vmem:[#allocation6 + $0x3c0] ss:$16 sps:$4 sm:$0xff]   ;;  %v102_v19 = vld [vmem:[#allocation3 + $0xa8] sm:$0xff] }
  0x4b   :  { %1522 = vmatprep.subr.bf16.mxu1 %v3226_v21  ;;  %v3254_v40 = vld [vmem:[#allocation6 + $0x1a4] ss:$16 sps:$4 sm:$0xff]   ;;  %v3258_v42 = vld [vmem:[#allocation6 + $0x1a0] ss:$16 sps:$4 sm:$0xff]   ;;  %v3301_v21 = vld [vmem:[#allocation6 + $0xcc] ss:$16 sps:$4 sm:$0xff]  }
  0x4c   :  { %v3256_v41 = vld [vmem:[#allocation6 + $0x3a4] ss:$16 sps:$4 sm:$0xff]   ;;  %v3259_v43 = vld [vmem:[#allocation6 + $0x3a0] ss:$16 sps:$4 sm:$0xff]  }
  0x4d   :  { %1410 = vmatpush1.bf16.msra.mxu0 %v3228_v22  ;;  %v3260_v44 = vld [vmem:[#allocation6 + $0x184] ss:$16 sps:$4 sm:$0xff]   ;;  %v3264_v50 = vld [vmem:[#allocation6 + $0x180] ss:$16 sps:$4 sm:$0xff]  }
  0x4e   :  { %1523 = vmatpush1.bf16.msra.mxu1 %v3229_v23  ;;  %1411 = vmatprep.subr.bf16.mxu0 %v3230_v24  ;;  %v3262_v45 = vld [vmem:[#allocation6 + $0x384] ss:$16 sps:$4 sm:$0xff]   ;;  %v3265_v51 = vld [vmem:[#allocation6 + $0x380] ss:$16 sps:$4 sm:$0xff]   ;;  %v3763_v23 = vpack.c.bf16 %v100_v15, %v94_v14  ;;  %v3765_v24 = vpack.c.bf16 %v102_v19, %v96_v18  ;;  %v132_v18 = vld [vmem:[#allocation3 + $0x198] sm:$0xff] }
  0x4f   :  { %1524 = vmatprep.subr.bf16.mxu1 %v3232_v25  ;;  %v3266_v52 = vld [vmem:[#allocation6 + $0x164] ss:$16 sps:$4 sm:$0xff]   ;;  %v3270_v56 = vld [vmem:[#allocation6 + $0x160] ss:$16 sps:$4 sm:$0xff]   ;;  %v3299_v25 = vld [vmem:[#allocation6 + $0xc8] ss:$16 sps:$4 sm:$0xff]  }
  0x50   :  { %v3268_v55 = vld [vmem:[#allocation6 + $0x364] ss:$16 sps:$4 sm:$0xff]   ;;  %v3271_v57 = vld [vmem:[#allocation6 + $0x360] ss:$16 sps:$4 sm:$0xff]   ;;  %v138_v19 = vld [vmem:[#allocation3 + $0x1c8] sm:$0xff] }
  0x51   :  { %1412 = vmatpush1.bf16.msra.mxu0 %v3234_v26  ;;  %v3272_v58 = vld [vmem:[#allocation6 + $0x144] ss:$16 sps:$4 sm:$0xff]   ;;  %v3276_v60 = vld [vmem:[#allocation6 + $0x140] ss:$16 sps:$4 sm:$0xff]  }
  0x52   :  { %1525 = vmatpush1.bf16.msra.mxu1 %v3235_v27  ;;  %1413 = vmatprep.subr.bf16.mxu0 %v3236_v28  ;;  %v3274_v59 = vld [vmem:[#allocation6 + $0x344] ss:$16 sps:$4 sm:$0xff]   ;;  %v3277_v61 = vld [vmem:[#allocation6 + $0x340] ss:$16 sps:$4 sm:$0xff]  }
  0x53   :  { %1526 = vmatprep.subr.bf16.mxu1 %v3238_v29  ;;  %v3278_v62 = vld [vmem:[#allocation6 + $0x124] ss:$16 sps:$4 sm:$0xff]   ;;  %v3282_v0 = vld [vmem:[#allocation6 + $0x120] ss:$16 sps:$4 sm:$0xff]  }
  0x54   :  { %v3280_v63 = vld [vmem:[#allocation6 + $0x324] ss:$16 sps:$4 sm:$0xff]   ;;  %v3283_v1 = vld [vmem:[#allocation6 + $0x320] ss:$16 sps:$4 sm:$0xff]  }
  0x55   :  { %1414 = vmatpush1.bf16.msra.mxu0 %v3240_v30  ;;  %v3284_v2 = vld [vmem:[#allocation6 + $0x104] ss:$16 sps:$4 sm:$0xff]   ;;  %v3288_v4 = vld [vmem:[#allocation6 + $0x100] ss:$16 sps:$4 sm:$0xff]  }
  0x56   :  { %1527 = vmatpush1.bf16.msra.mxu1 %v3241_v31  ;;  %1415 = vmatprep.subr.bf16.mxu0 %v3242_v32  ;;  %v3286_v3 = vld [vmem:[#allocation6 + $0x304] ss:$16 sps:$4 sm:$0xff]   ;;  %v3289_v5 = vld [vmem:[#allocation6 + $0x300] ss:$16 sps:$4 sm:$0xff]   ;;  %v3307_v31 = vld [vmem:[#allocation6 + $0xac] ss:$16 sps:$4 sm:$0xff]  }
  0x57   :  { %1528 = vmatprep.subr.bf16.mxu1 %v3244_v33  ;;  %v81_v6 = vld [vmem:[#allocation3] sm:$0xff]  ;;  %v87_v7 = vld [vmem:[#allocation3 + $0x30] sm:$0xff]  ;;  %v3305_v33 = vld [vmem:[#allocation6 + $0xa8] ss:$16 sps:$4 sm:$0xff]  }
  0x58   :  { %v83_v8 = vld [vmem:[#allocation3 + $0x10] sm:$0xff]  ;;  %v89_v9 = vld [vmem:[#allocation3 + $0x40] sm:$0xff]  ;;  %v3759_v16 = vpack.c.bf16 %v87_v7, %v81_v6 }
  0x59   :  { %1416 = vmatpush2.bf16.msra.mxu0 %v3246_v34  ;;  %v3292_v10 = vld [vmem:[#allocation6 + $0x4e4] ss:$16 sps:$4 sm:$0xff]   ;;  %v3290_v12 = vld [vmem:[#allocation6 + $0x4e0] ss:$16 sps:$4 sm:$0xff]   ;;  %v3761_v17 = vpack.c.bf16 %v89_v9, %v83_v8  ;;  %v106_v34 = vld [vmem:[#allocation3 + $0xc8] sm:$0xff] }
  0x5a   :  { %1529 = vmatpush2.bf16.msra.mxu1 %v3247_v35  ;;  %1417 = vmatprep.subr.bf16.mxu0 %v3248_v36  ;;  %v3298_v20 = vld [vmem:[#allocation6 + $0x4c4] ss:$16 sps:$4 sm:$0xff]   ;;  %v3296_v22 = vld [vmem:[#allocation6 + $0x4c0] ss:$16 sps:$4 sm:$0xff]   ;;  %v112_v35 = vld [vmem:[#allocation3 + $0xf8] sm:$0xff] }
  0x5b   :  { %1530 = vmatprep.subr.bf16.mxu1 %v3250_v37  ;;  %v93_v26 = vld [vmem:[#allocation3 + $0x60] sm:$0xff]  ;;  %v99_v27 = vld [vmem:[#allocation3 + $0x90] sm:$0xff]  ;;  %v3331_v9 = vld [vmem:[#allocation6 + $0x2c] ss:$16 sps:$4 sm:$0xff]  }
  0x5c   :  { %v95_v28 = vld [vmem:[#allocation3 + $0x70] sm:$0xff]  ;;  %v101_v29 = vld [vmem:[#allocation3 + $0xa0] sm:$0xff]  ;;  %v3771_v36 = vpack.c.bf16 %v99_v27, %v93_v26  ;;  %v3801_v26 = vpack.c.bf16 %v138_v19, %v132_v18  ;;  %v3335_v27 = vld [vmem:[#allocation6 + $0x8] ss:$16 sps:$4 sm:$0xff]  }
  0x5d   :  { %1418 = vmatpush2.bf16.msra.mxu0 %v3252_v38  ;;  %v3304_v30 = vld [vmem:[#allocation6 + $0x4a4] ss:$16 sps:$4 sm:$0xff]   ;;  %v3302_v32 = vld [vmem:[#allocation6 + $0x4a0] ss:$16 sps:$4 sm:$0xff]   ;;  %v3773_v37 = vpack.c.bf16 %v101_v29, %v95_v28  ;;  %v108_v38 = vld [vmem:[#allocation3 + $0xd8] sm:$0xff] }
  0x5e   :  { %1531 = vmatpush2.bf16.msra.mxu1 %v3253_v39  ;;  %1419 = vmatprep.subr.bf16.mxu0 %v3254_v40  ;;  %v114_v39 = vld [vmem:[#allocation3 + $0x108] sm:$0xff]  ;;  %v3310_v40 = vld [vmem:[#allocation6 + $0x484] ss:$16 sps:$4 sm:$0xff]  }
  0x5f   :  { %1532 = vmatprep.subr.bf16.mxu1 %v3256_v41  ;;  %v3313_v41 = vld [vmem:[#allocation6 + $0x8c] ss:$16 sps:$4 sm:$0xff]   ;;  %v105_v46 = vld [vmem:[#allocation3 + $0xc0] sm:$0xff]  ;;  %v111_v47 = vld [vmem:[#allocation3 + $0xf0] sm:$0xff] }
  0x60   :  { %v107_v48 = vld [vmem:[#allocation3 + $0xd0] sm:$0xff]  ;;  %v113_v49 = vld [vmem:[#allocation3 + $0x100] sm:$0xff] }
  0x61   :  { %1420 = vmatpush2.bf16.msra.mxu0 %v3258_v42  ;;  %v3308_v42 = vld [vmem:[#allocation6 + $0x480] ss:$16 sps:$4 sm:$0xff]   ;;  %v3328_v8 = vld [vmem:[#allocation6 + $0x424] ss:$16 sps:$4 sm:$0xff]  }
  0x62   :  { %1533 = vmatpush2.bf16.msra.mxu1 %v3259_v43  ;;  %1421 = vmatprep.subr.bf16.mxu0 %v3260_v44  ;;  %v3775_v43 = vpack.c.bf16 %v112_v35, %v106_v34  ;;  %v3777_v44 = vpack.c.bf16 %v114_v39, %v108_v38  ;;  %v119_v6 = vld [vmem:[#allocation3 + $0x130] sm:$0xff]  ;;  %v125_v7 = vld [vmem:[#allocation3 + $0x160] sm:$0xff]  ;;  %v3341_v35 = vld [vmem:[#allocation6 + $0x1e8] ss:$16 sps:$4 sm:$0xff]  }
  0x63   :  { %1534 = vmatprep.subr.bf16.mxu1 %v3262_v45  ;;  %v3311_v45 = vld [vmem:[#allocation6 + $0x88] ss:$16 sps:$4 sm:$0xff]   ;;  %v3797_v15 = vpack.c.bf16 %v125_v7, %v119_v6  ;;  %v129_v28 = vld [vmem:[#allocation3 + $0x180] sm:$0xff]  ;;  %v135_v29 = vld [vmem:[#allocation3 + $0x1b0] sm:$0xff] }
  0x64   :  { %v3338_v34 = vld [vmem:[#allocation6 + $0x5e0] ss:$16 sps:$4 sm:$0xff]   ;;  %v142_v38 = vld [vmem:[#allocation3 + $0x1e8] sm:$0xff]  ;;  %v148_v39 = vld [vmem:[#allocation3 + $0x218] sm:$0xff] }
  0x65   :  { %1422 = vmatpush2.bf16.msra.mxu0 %v3264_v50  ;;  %v3316_v50 = vld [vmem:[#allocation6 + $0x464] ss:$16 sps:$4 sm:$0xff]   ;;  %v156_v6 = vld [vmem:[#allocation3 + $0x258] sm:$0xff]  ;;  %v162_v7 = vld [vmem:[#allocation3 + $0x288] sm:$0xff] }
  0x66   :  { %1535 = vmatpush2.bf16.msra.mxu1 %v3265_v51  ;;  %1423 = vmatprep.subr.bf16.mxu0 %v3266_v52  ;;  %v3319_v51 = vld [vmem:[#allocation6 + $0x6c] ss:$16 sps:$4 sm:$0xff]   ;;  %v3314_v52 = vld [vmem:[#allocation6 + $0x460] ss:$16 sps:$4 sm:$0xff]  }
  0x67   :  { %1536 = vmatprep.subr.bf16.mxu1 %v3268_v55  ;;  %v3317_v55 = vld [vmem:[#allocation6 + $0x68] ss:$16 sps:$4 sm:$0xff]   ;;  %v153_v18 = vld [vmem:[#allocation3 + $0x240] sm:$0xff]  ;;  %v159_v19 = vld [vmem:[#allocation3 + $0x270] sm:$0xff] }
  0x69   :  { %1424 = vmatpush2.bf16.msra.mxu0 %v3270_v56  ;;  %v118_v56 = vld [vmem:[#allocation3 + $0x128] sm:$0xff] }
  0x6a   :  { %1537 = vmatpush2.bf16.msra.mxu1 %v3271_v57  ;;  %1425 = vmatprep.subr.bf16.mxu0 %v3272_v58  ;;  %v124_v57 = vld [vmem:[#allocation3 + $0x158] sm:$0xff]  ;;  %v3783_v58 = vpack.c.bf16 %v111_v47, %v105_v46  ;;  %v3346_v46 = vld [vmem:[#allocation6 + $0x5c4] ss:$16 sps:$4 sm:$0xff]  }
  0x6b   :  { %1538 = vmatprep.subr.bf16.mxu1 %v3274_v59  ;;  %v3785_v59 = vpack.c.bf16 %v113_v49, %v107_v48  ;;  %v3349_v47 = vld [vmem:[#allocation6 + $0x1cc] ss:$16 sps:$4 sm:$0xff]   ;;  %v3344_v48 = vld [vmem:[#allocation6 + $0x5c0] ss:$16 sps:$4 sm:$0xff]   ;;  %v3811_v49 = vpack.c.bf16 %v148_v39, %v142_v38  ;;  %v3370_v38 = vld [vmem:[#allocation6 + $0x544] ss:$16 sps:$4 sm:$0xff]  }
  0x6c   :  { %v3373_v39 = vld [vmem:[#allocation6 + $0x14c] ss:$16 sps:$4 sm:$0xff]  }
  0x6d   :  { %1426 = vmatpush2.bf16.msra.mxu0 %v3276_v60  ;;  %v120_v60 = vld [vmem:[#allocation3 + $0x138] sm:$0xff] }
  0x6e   :  { %1539 = vmatpush2.bf16.msra.mxu1 %v3277_v61  ;;  %1427 = vmatprep.subr.bf16.mxu0 %v3278_v62  ;;  %v126_v61 = vld [vmem:[#allocation3 + $0x168] sm:$0xff]  ;;  %v3322_v62 = vld [vmem:[#allocation6 + $0x444] ss:$16 sps:$4 sm:$0xff]  }
  0x6f   :  { %1540 = vmatprep.subr.bf16.mxu1 %v3280_v63  ;;  %v3325_v63 = vld [vmem:[#allocation6 + $0x4c] ss:$16 sps:$4 sm:$0xff]  }
  0x71   :  { %1428 = vmatpush2.bf16.msra.mxu0 %v3282_v0  ;;  %v3320_v0 = vld [vmem:[#allocation6 + $0x440] ss:$16 sps:$4 sm:$0xff]  }
  0x72   :  { %1541 = vmatpush2.bf16.msra.mxu1 %v3283_v1  ;;  %1429 = vmatprep.subr.bf16.mxu0 %v3284_v2  ;;  %v3787_v1 = vpack.c.bf16 %v124_v57, %v118_v56  ;;  %v3789_v2 = vpack.c.bf16 %v126_v61, %v120_v60  ;;  %v143_v56 = vld [vmem:[#allocation3 + $0x1f0] sm:$0xff]  ;;  %v149_v57 = vld [vmem:[#allocation3 + $0x220] sm:$0xff]  ;;  %v3355_v61 = vld [vmem:[#allocation6 + $0x1ac] ss:$16 sps:$4 sm:$0xff]  }
  0x73   :  { %1542 = vmatprep.subr.bf16.mxu1 %v3286_v3  ;;  %v3323_v3 = vld [vmem:[#allocation6 + $0x48] ss:$16 sps:$4 sm:$0xff]   ;;  %v3352_v60 = vld [vmem:[#allocation6 + $0x5a4] ss:$16 sps:$4 sm:$0xff]  }
  0x75   :  { %1430 = vmatpush2.bf16.msra.mxu0 %v3288_v4  ;;  %v117_v4 = vld [vmem:[#allocation3 + $0x120] sm:$0xff] }
  0x76   :  { %1543 = vmatpush2.bf16.msra.mxu1 %v3289_v5  ;;  %1625 = vmatprep.subr.bf16.mxu0 %v3292_v10  ;;  %v123_v5 = vld [vmem:[#allocation3 + $0x150] sm:$0xff] }
  0x77   :  { %1738 = vmatprep.subr.bf16.mxu1 %v3295_v11  ;;  %v3326_v10 = vld [vmem:[#allocation6 + $0x420] ss:$16 sps:$4 sm:$0xff]   ;;  %v3329_v11 = vld [vmem:[#allocation6 + $0x28] ss:$16 sps:$4 sm:$0xff]   ;;  %v3795_v14 = vpack.c.bf16 %v123_v5, %v117_v4  ;;  %v3821_v5 = vpack.c.bf16 %v149_v57, %v143_v56  ;;  %v3376_v56 = vld [vmem:[#allocation6 + $0x524] ss:$16 sps:$4 sm:$0xff]  }
  0x78   :  { %1432 = vmatmul.mubr.bf16.vlgmr.msra.gmra.mxu0 %v3759_v16  ;;  %v3379_v57 = vld [vmem:[#allocation6 + $0x12c] ss:$16 sps:$4 sm:$0xff]  }
  0x79   :  { %1545 = vmatmul.mubr.bf16.vlgmr.msra.gmra.mxu1 %v3761_v17  ;;  %1626 = vmatpush1.bf16.msra.mxu0 %v3290_v12  ;;  %v130_v12 = vld [vmem:[#allocation3 + $0x188] sm:$0xff] }
  0x7a   :  { %1739 = vmatpush1.bf16.msra.mxu1 %v3293_v13  ;;  %1627 = vmatprep.subr.bf16.mxu0 %v3298_v20  ;;  %v136_v13 = vld [vmem:[#allocation3 + $0x1b8] sm:$0xff]  ;;  %v3334_v20 = vld [vmem:[#allocation6 + $0x404] ss:$16 sps:$4 sm:$0xff]  }
  0x7b   :  { %1740 = vmatprep.subr.bf16.mxu1 %v3301_v21  ;;  %1441 = vmatprep.mubr.bf16.mxu0 %v3763_v23  ;;  %v3337_v21 = vld [vmem:[#allocation6 + $0xc] ss:$16 sps:$4 sm:$0xff]  }
  0x7c   :  { %1554 = vmatprep.mubr.bf16.mxu1 %v3765_v24 }
  0x7d   :  { %1628 = vmatpush1.bf16.msra.mxu0 %v3296_v22  ;;  %v3332_v22 = vld [vmem:[#allocation6 + $0x400] ss:$16 sps:$4 sm:$0xff]  }
  0x7e   :  { %1741 = vmatpush1.bf16.msra.mxu1 %v3299_v25  ;;  %1629 = vmatprep.subr.bf16.mxu0 %v3304_v30  ;;  %v3799_v25 = vpack.c.bf16 %v136_v13, %v130_v12  ;;  %v131_v30 = vld [vmem:[#allocation3 + $0x190] sm:$0xff]  ;;  %v3825_v13 = vpack.c.bf16 %v162_v7, %v156_v6  ;;  %v3385_v7 = vld [vmem:[#allocation6 + $0x10c] ss:$16 sps:$4 sm:$0xff]  }
  0x7f   :  { %1742 = vmatprep.subr.bf16.mxu1 %v3307_v31  ;;  %v137_v31 = vld [vmem:[#allocation3 + $0x1c0] sm:$0xff] }
  0x80   :  { %1442 = vmatmul.mubr.bf16.gmra.mxu0 %v3771_v36  ;;  %v3382_v6 = vld [vmem:[#allocation6 + $0x504] ss:$16 sps:$4 sm:$0xff]  }
  0x81   :  { %1555 = vmatmul.mubr.bf16.gmra.mxu1 %v3773_v37  ;;  %1630 = vmatpush1.bf16.msra.mxu0 %v3302_v32  ;;  %v3340_v32 = vld [vmem:[#allocation6 + $0x5e4] ss:$16 sps:$4 sm:$0xff]  }
  0x82   :  { %1743 = vmatpush1.bf16.msra.mxu1 %v3305_v33  ;;  %1631 = vmatprep.subr.bf16.mxu0 %v3310_v40  ;;  %v3343_v33 = vld [vmem:[#allocation6 + $0x1ec] ss:$16 sps:$4 sm:$0xff]   ;;  %v3807_v40 = vpack.c.bf16 %v135_v29, %v129_v28  ;;  %v3362_v28 = vld [vmem:[#allocation6 + $0x560] ss:$16 sps:$4 sm:$0xff]  }
  0x83   :  { %1744 = vmatprep.subr.bf16.mxu1 %v3313_v41  ;;  %1451 = vmatprep.mubr.bf16.mxu0 %v3775_v43  ;;  %v3809_v41 = vpack.c.bf16 %v137_v31, %v131_v30  ;;  %v166_v29 = vld [vmem:[#allocation3 + $0x2a8] sm:$0xff]  ;;  %v172_v30 = vld [vmem:[#allocation3 + $0x2d8] sm:$0xff]  ;;  %v3831_v31 = vpack.c.bf16 %v159_v19, %v153_v18  ;;  %v91_v18 = vld [vmem:[#allocation3 + $0x50] sm:$0xff] }
  0x84   :  { %1564 = vmatprep.mubr.bf16.mxu1 %v3777_v44  ;;  %v3388_v19 = vld [vmem:[#allocation6 + $0x2ec] ss:$16 sps:$4 sm:$0xff]  }
  0x85   :  { %1632 = vmatpush1.bf16.msra.mxu0 %v3308_v42  ;;  %v144_v42 = vld [vmem:[#allocation3 + $0x1f8] sm:$0xff] }
  0x86   :  { %1745 = vmatpush1.bf16.msra.mxu1 %v3311_v45  ;;  %1633 = vmatprep.subr.bf16.mxu0 %v3316_v50  ;;  %v150_v45 = vld [vmem:[#allocation3 + $0x228] sm:$0xff] }
  0x87   :  { %1746 = vmatprep.subr.bf16.mxu1 %v3319_v51  ;;  %v3813_v50 = vpack.c.bf16 %v150_v45, %v144_v42  ;;  %v3347_v51 = vld [vmem:[#allocation6 + $0x1c8] ss:$16 sps:$4 sm:$0xff]   ;;  %v3368_v42 = vld [vmem:[#allocation6 + $0x540] ss:$16 sps:$4 sm:$0xff]  }
  0x88   :  { %1452 = vmatmul.mubr.bf16.gmra.mxu0 %v3783_v58  ;;  %v3371_v45 = vld [vmem:[#allocation6 + $0x148] ss:$16 sps:$4 sm:$0xff]  }
  0x89   :  { %1565 = vmatmul.mubr.bf16.gmra.mxu1 %v3785_v59  ;;  %1634 = vmatpush1.bf16.msra.mxu0 %v3314_v52  ;;  %v141_v52 = vld [vmem:[#allocation3 + $0x1e0] sm:$0xff] }
  0x8a   :  { %1747 = vmatpush1.bf16.msra.mxu1 %v3317_v55  ;;  %1635 = vmatprep.subr.bf16.mxu0 %v3322_v62  ;;  %v147_v55 = vld [vmem:[#allocation3 + $0x210] sm:$0xff] }
  0x8b   :  { %1748 = vmatprep.subr.bf16.mxu1 %v3325_v63  ;;  %1461 = vmatprep.mubr.bf16.mxu0 %v3787_v1  ;;  %v3350_v62 = vld [vmem:[#allocation6 + $0x5a0] ss:$16 sps:$4 sm:$0xff]   ;;  %v3353_v63 = vld [vmem:[#allocation6 + $0x1a8] ss:$16 sps:$4 sm:$0xff]   ;;  %v3819_v4 = vpack.c.bf16 %v147_v55, %v141_v52 }
  0x8c   :  { %1574 = vmatprep.mubr.bf16.mxu1 %v3789_v2  ;;  %v167_v52 = vld [vmem:[#allocation3 + $0x2b0] sm:$0xff]  ;;  %v173_v55 = vld [vmem:[#allocation3 + $0x2e0] sm:$0xff] }
  0x8d   :  { %1636 = vmatpush1.bf16.msra.mxu0 %v3320_v0  ;;  %v154_v0 = vld [vmem:[#allocation3 + $0x248] sm:$0xff] }
  0x8e   :  { %1749 = vmatpush1.bf16.msra.mxu1 %v3323_v3  ;;  %1637 = vmatprep.subr.bf16.mxu0 %v3328_v8  ;;  %v160_v3 = vld [vmem:[#allocation3 + $0x278] sm:$0xff]  ;;  %v3358_v8 = vld [vmem:[#allocation6 + $0x584] ss:$16 sps:$4 sm:$0xff]  }
  0x8f   :  { %1750 = vmatprep.subr.bf16.mxu1 %v3331_v9  ;;  %v3361_v9 = vld [vmem:[#allocation6 + $0x18c] ss:$16 sps:$4 sm:$0xff]   ;;  %v3823_v12 = vpack.c.bf16 %v160_v3, %v154_v0  ;;  %v3374_v0 = vld [vmem:[#allocation6 + $0x520] ss:$16 sps:$4 sm:$0xff]   ;;  %v3377_v3 = vld [vmem:[#allocation6 + $0x128] ss:$16 sps:$4 sm:$0xff]  }
  0x90   :  { %1462 = vmatmul.mubr.bf16.gmra.mxu0 %v3795_v14 }
  0x91   :  { %1575 = vmatmul.mubr.bf16.gmra.mxu1 %v3797_v15  ;;  %1638 = vmatpush1.bf16.msra.mxu0 %v3326_v10  ;;  %v3356_v10 = vld [vmem:[#allocation6 + $0x580] ss:$16 sps:$4 sm:$0xff]  }
  0x92   :  { %1751 = vmatpush1.bf16.msra.mxu1 %v3329_v11  ;;  %1639 = vmatprep.subr.bf16.mxu0 %v3334_v20  ;;  %v3359_v11 = vld [vmem:[#allocation6 + $0x188] ss:$16 sps:$4 sm:$0xff]   ;;  %v155_v20 = vld [vmem:[#allocation3 + $0x250] sm:$0xff] }
  0x93   :  { %1752 = vmatprep.subr.bf16.mxu1 %v3337_v21  ;;  %1471 = vmatprep.mubr.bf16.mxu0 %v3799_v25  ;;  %v161_v21 = vld [vmem:[#allocation3 + $0x280] sm:$0xff] }
  0x94   :  { %1584 = vmatprep.mubr.bf16.mxu1 %v3801_v26 }
  0x95   :  { %1640 = vmatpush1.bf16.msra.mxu0 %v3332_v22  ;;  %v3364_v22 = vld [vmem:[#allocation6 + $0x564] ss:$16 sps:$4 sm:$0xff]  }
  0x96   :  { %1753 = vmatpush1.bf16.msra.mxu1 %v3335_v27  ;;  %1641 = vmatprep.subr.bf16.mxu0 %v3340_v32  ;;  %v3367_v27 = vld [vmem:[#allocation6 + $0x16c] ss:$16 sps:$4 sm:$0xff]   ;;  %v3833_v32 = vpack.c.bf16 %v161_v21, %v155_v20  ;;  %v3386_v21 = vld [vmem:[#allocation6 + $0x2e8] ss:$16 sps:$4 sm:$0xff]  }
  0x97   :  { %1754 = vmatprep.subr.bf16.mxu1 %v3343_v33  ;;  %v168_v33 = vld [vmem:[#allocation3 + $0x2b8] sm:$0xff] }
  0x98   :  { %1472 = vmatmul.mubr.bf16.gmra.mxu0 %v3807_v40  ;;  %v3391_v20 = vld [vmem:[#allocation6 + $0x4ec] ss:$16 sps:$4 sm:$0xff]  }
  0x99   :  { %1585 = vmatmul.mubr.bf16.gmra.mxu1 %v3809_v41  ;;  %1642 = vmatpush2.bf16.msra.mxu0 %v3338_v34  ;;  %v174_v34 = vld [vmem:[#allocation3 + $0x2e8] sm:$0xff] }
  0x9a   :  { %1755 = vmatpush2.bf16.msra.mxu1 %v3341_v35  ;;  %1643 = vmatprep.subr.bf16.mxu0 %v3346_v46  ;;  %v3365_v35 = vld [vmem:[#allocation6 + $0x168] ss:$16 sps:$4 sm:$0xff]   ;;  %v3835_v46 = vpack.c.bf16 %v172_v30, %v166_v29  ;;  %v3394_v30 = vld [vmem:[#allocation6 + $0x2cc] ss:$16 sps:$4 sm:$0xff]  }
  0x9b   :  { %1756 = vmatprep.subr.bf16.mxu1 %v3349_v47  ;;  %1481 = vmatprep.mubr.bf16.mxu0 %v3811_v49  ;;  %v3837_v47 = vpack.c.bf16 %v174_v34, %v168_v33  ;;  %v104_v29 = vld [vmem:[#allocation3 + $0xb8] sm:$0xff] }
  0x9c   :  { %1594 = vmatprep.mubr.bf16.mxu1 %v3813_v50  ;;  %v3397_v33 = vld [vmem:[#allocation6 + $0x4cc] ss:$16 sps:$4 sm:$0xff]   ;;  %v3392_v34 = vld [vmem:[#allocation6 + $0x2c8] ss:$16 sps:$4 sm:$0xff]  }
  0x9d   :  { %1644 = vmatpush2.bf16.msra.mxu0 %v3344_v48  ;;  %v165_v48 = vld [vmem:[#allocation3 + $0x2a0] sm:$0xff] }
  0x9e   :  { %1757 = vmatpush2.bf16.msra.mxu1 %v3347_v51  ;;  %1645 = vmatprep.subr.bf16.mxu0 %v3352_v60  ;;  %v171_v51 = vld [vmem:[#allocation3 + $0x2d0] sm:$0xff] }
  0x9f   :  { %1758 = vmatprep.subr.bf16.mxu1 %v3355_v61  ;;  %v3843_v60 = vpack.c.bf16 %v171_v51, %v165_v48  ;;  %v3845_v61 = vpack.c.bf16 %v173_v55, %v167_v52  ;;  %v3398_v48 = vld [vmem:[#allocation6 + $0x2a8] ss:$16 sps:$4 sm:$0xff]  }
  0xa0   :  { %1482 = vmatmul.mubr.bf16.gmra.mxu0 %v3819_v4  ;;  %v3401_v51 = vld [vmem:[#allocation6 + $0x4a8] ss:$16 sps:$4 sm:$0xff]  }
  0xa1   :  { %1595 = vmatmul.mubr.bf16.gmra.mxu1 %v3821_v5  ;;  %1646 = vmatpush2.bf16.msra.mxu0 %v3350_v62  ;;  %v86_v62 = vld [vmem:[#allocation3 + $0x28] sm:$0xff] }
  0xa2   :  { %1759 = vmatpush2.bf16.msra.mxu1 %v3353_v63  ;;  %1647 = vmatprep.subr.bf16.mxu0 %v3358_v8  ;;  %v92_v63 = vld [vmem:[#allocation3 + $0x58] sm:$0xff]  ;;  %v3380_v8 = vld [vmem:[#allocation6 + $0x500] ss:$16 sps:$4 sm:$0xff]   ;;  %v110_v55 = vld [vmem:[#allocation3 + $0xe8] sm:$0xff] }
  0xa3   :  { %1760 = vmatprep.subr.bf16.mxu1 %v3361_v9  ;;  %1491 = vmatprep.mubr.bf16.mxu0 %v3823_v12  ;;  %v3383_v9 = vld [vmem:[#allocation6 + $0x108] ss:$16 sps:$4 sm:$0xff]  }
  0xa4   :  { %1604 = vmatprep.mubr.bf16.mxu1 %v3825_v13 }
  0xa5   :  { %1648 = vmatpush2.bf16.msra.mxu0 %v3356_v10  ;;  %v3847_v10 = vpack.c.bf16 %v92_v63, %v86_v62  ;;  %v3404_v63 = vld [vmem:[#allocation6 + $0x288] ss:$16 sps:$4 sm:$0xff]  }
  0xa6   :  { %1761 = vmatpush2.bf16.msra.mxu1 %v3359_v11  ;;  %1649 = vmatprep.subr.bf16.mxu0 %v3364_v22  ;;  %v85_v11 = vld [vmem:[#allocation3 + $0x20] sm:$0xff] }
  0xa7   :  { %1762 = vmatprep.subr.bf16.mxu1 %v3367_v27  ;;  %v3853_v22 = vpack.c.bf16 %v91_v18, %v85_v11  ;;  %v3389_v27 = vld [vmem:[#allocation6 + $0x4e8] ss:$16 sps:$4 sm:$0xff]  }
  0xa8   :  { %1492 = vmatmul.mubr.bf16.gmra.mxu0 %v3831_v31  ;;  %v122_v18 = vld [vmem:[#allocation3 + $0x148] sm:$0xff] }
  0xa9   :  { %1605 = vmatmul.mubr.bf16.gmra.mxu1 %v3833_v32  ;;  %1650 = vmatpush2.bf16.msra.mxu0 %v3362_v28  ;;  %v98_v28 = vld [vmem:[#allocation3 + $0x88] sm:$0xff] }
  0xaa   :  { %1763 = vmatpush2.bf16.msra.mxu1 %v3365_v35  ;;  %1651 = vmatprep.subr.bf16.mxu0 %v3370_v38  ;;  %v3855_v35 = vpack.c.bf16 %v104_v29, %v98_v28  ;;  %v97_v38 = vld [vmem:[#allocation3 + $0x80] sm:$0xff]  ;;  %v127_v29 = vld [vmem:[#allocation3 + $0x170] sm:$0xff] }
  0xab   :  { %1764 = vmatprep.subr.bf16.mxu1 %v3373_v39  ;;  %1501 = vmatprep.mubr.bf16.mxu0 %v3835_v46  ;;  %v103_v39 = vld [vmem:[#allocation3 + $0xb0] sm:$0xff]  ;;  %v121_v28 = vld [vmem:[#allocation3 + $0x140] sm:$0xff] }
  0xac   :  { %1614 = vmatprep.mubr.bf16.mxu1 %v3837_v47  ;;  %v3861_v52 = vpack.c.bf16 %v103_v39, %v97_v38  ;;  %v134_v38 = vld [vmem:[#allocation3 + $0x1a8] sm:$0xff]  ;;  %v140_v39 = vld [vmem:[#allocation3 + $0x1d8] sm:$0xff] }
  0xad   :  { %1652 = vmatpush2.bf16.msra.mxu0 %v3368_v42  ;;  %v3400_v42 = vld [vmem:[#allocation6 + $0x2ac] ss:$16 sps:$4 sm:$0xff]  }
  0xae   :  { %1765 = vmatpush2.bf16.msra.mxu1 %v3371_v45  ;;  %1653 = vmatprep.subr.bf16.mxu0 %v3376_v56  ;;  %v3403_v45 = vld [vmem:[#allocation6 + $0x4ac] ss:$16 sps:$4 sm:$0xff]  }
  0xaf   :  { %1766 = vmatprep.subr.bf16.mxu1 %v3379_v57  ;;  %v116_v56 = vld [vmem:[#allocation3 + $0x118] sm:$0xff] }
  0xb0   :  { %1502 = vmatmul.mubr.bf16.gmra.mxu0 %v3843_v60  ;;  %v3409_v57 = vld [vmem:[#allocation6 + $0x48c] ss:$16 sps:$4 sm:$0xff]   ;;  %v3863_v62 = vpack.c.bf16 %v116_v56, %v110_v55  ;;  %v3879_v55 = vpack.c.bf16 %v140_v39, %v134_v38  ;;  %v139_v56 = vld [vmem:[#allocation3 + $0x1d0] sm:$0xff]  ;;  %v3455_v38 = vld [vmem:[#allocation6 + $0x588] ss:$16 sps:$4 sm:$0xff]  }
  0xb1   :  { %1615 = vmatmul.mubr.bf16.gmra.mxu1 %v3845_v61  ;;  %1654 = vmatpush2.bf16.msra.mxu0 %v3374_v0  ;;  %v109_v0 = vld [vmem:[#allocation3 + $0xe0] sm:$0xff] }
  0xb2   :  { %1767 = vmatpush2.bf16.msra.mxu1 %v3377_v3  ;;  %1655 = vmatprep.subr.bf16.mxu0 %v3382_v6  ;;  %v115_v3 = vld [vmem:[#allocation3 + $0x110] sm:$0xff]  ;;  %v3412_v6 = vld [vmem:[#allocation6 + $0x26c] ss:$16 sps:$4 sm:$0xff]  }
  0xb3   :  { %1768 = vmatprep.subr.bf16.mxu1 %v3385_v7  ;;  %1657 = vmatprep.mubr.bf16.mxu0 %v3847_v10  ;;  %v3415_v7 = vld [vmem:[#allocation6 + $0x46c] ss:$16 sps:$4 sm:$0xff]   ;;  %v3869_v11 = vpack.c.bf16 %v115_v3, %v109_v0 }
  0xb4   :  { %1770 = vmatprep.mubr.bf16.mxu1 %v3753_v53  ;;  %v3395_v53 = vld [vmem:[#allocation6 + $0x4c8] ss:$16 sps:$4 sm:$0xff]  }
  0xb5   :  { %1656 = vmatpush2.bf16.msra.mxu0 %v3380_v8  ;;  %v3410_v8 = vld [vmem:[#allocation6 + $0x268] ss:$16 sps:$4 sm:$0xff]  }
  0xb6   :  { %1769 = vmatpush2.bf16.msra.mxu1 %v3383_v9  ;;  %1851 = vmatprep.subr.bf16.mxu0 %v3388_v19  ;;  %v3413_v9 = vld [vmem:[#allocation6 + $0x468] ss:$16 sps:$4 sm:$0xff]   ;;  %v3418_v19 = vld [vmem:[#allocation6 + $0x24c] ss:$16 sps:$4 sm:$0xff]  }
  0xb7   :  { %1964 = vmatprep.subr.bf16.mxu1 %v3391_v20  ;;  %v3421_v20 = vld [vmem:[#allocation6 + $0x44c] ss:$16 sps:$4 sm:$0xff]  }
  0xb8   :  { %1658 = vmatmul.mubr.bf16.vlgmr.msra.gmra.mxu0 %v3853_v22  ;;  %v146_v0 = vld [vmem:[#allocation3 + $0x208] sm:$0xff]  ;;  %v152_v3 = vld [vmem:[#allocation3 + $0x238] sm:$0xff] }
  0xb9   :  { %1771 = vmatmul.mubr.bf16.vlgmr.msra.gmra.mxu1 %v3759_v16  ;;  %1852 = vmatpush1.bf16.msra.mxu0 %v3386_v21  ;;  %v3406_v16 = vld [vmem:[#allocation6 + $0x28c] ss:$16 sps:$4 sm:$0xff]   ;;  %v3416_v21 = vld [vmem:[#allocation6 + $0x248] ss:$16 sps:$4 sm:$0xff]  }
  0xba   :  { %1965 = vmatpush1.bf16.msra.mxu1 %v3389_v27  ;;  %1853 = vmatprep.subr.bf16.mxu0 %v3394_v30  ;;  %v3424_v30 = vld [vmem:[#allocation6 + $0x22c] ss:$16 sps:$4 sm:$0xff]  }
  0xbb   :  { %1966 = vmatprep.subr.bf16.mxu1 %v3397_v33  ;;  %1667 = vmatprep.mubr.bf16.mxu0 %v3855_v35  ;;  %v3427_v33 = vld [vmem:[#allocation6 + $0x42c] ss:$16 sps:$4 sm:$0xff]  }
  0xbc   :  { %1780 = vmatprep.mubr.bf16.mxu1 %v3763_v23  ;;  %v3407_v23 = vld [vmem:[#allocation6 + $0x488] ss:$16 sps:$4 sm:$0xff]  }
  0xbd   :  { %1854 = vmatpush1.bf16.msra.mxu0 %v3392_v34  ;;  %v3422_v34 = vld [vmem:[#allocation6 + $0x228] ss:$16 sps:$4 sm:$0xff]  }
  0xbe   :  { %1967 = vmatpush1.bf16.msra.mxu1 %v3395_v53  ;;  %1855 = vmatprep.subr.bf16.mxu0 %v3400_v42  ;;  %v3877_v53 = vpack.c.bf16 %v127_v29, %v121_v28  ;;  %v3430_v42 = vld [vmem:[#allocation6 + $0x20c] ss:$16 sps:$4 sm:$0xff]  }
  0xbf   :  { %1968 = vmatprep.subr.bf16.mxu1 %v3403_v45  ;;  %v3433_v45 = vld [vmem:[#allocation6 + $0x40c] ss:$16 sps:$4 sm:$0xff]  }
  0xc0   :  { %1668 = vmatmul.mubr.bf16.gmra.mxu0 %v3861_v52  ;;  %v164_v29 = vld [vmem:[#allocation3 + $0x298] sm:$0xff] }
  0xc1   :  { %1781 = vmatmul.mubr.bf16.gmra.mxu1 %v3771_v36  ;;  %1856 = vmatpush1.bf16.msra.mxu0 %v3398_v48  ;;  %v128_v36 = vld [vmem:[#allocation3 + $0x178] sm:$0xff] }
  0xc2   :  { %1969 = vmatpush1.bf16.msra.mxu1 %v3401_v51  ;;  %1857 = vmatprep.subr.bf16.mxu0 %v3406_v16  ;;  %v3871_v27 = vpack.c.bf16 %v128_v36, %v122_v18  ;;  %v3428_v48 = vld [vmem:[#allocation6 + $0x208] ss:$16 sps:$4 sm:$0xff]   ;;  %v3436_v16 = vld [vmem:[#allocation6 + $0x3ec] ss:$16 sps:$4 sm:$0xff]   ;;  %v3887_v18 = vpack.c.bf16 %v152_v3, %v146_v0  ;;  %v151_v36 = vld [vmem:[#allocation3 + $0x230] sm:$0xff] }
  0xc3   :  { %1970 = vmatprep.subr.bf16.mxu1 %v3409_v57  ;;  %1677 = vmatprep.mubr.bf16.mxu0 %v3863_v62  ;;  %v3431_v51 = vld [vmem:[#allocation6 + $0x408] ss:$16 sps:$4 sm:$0xff]   ;;  %v3439_v57 = vld [vmem:[#allocation6 + $0x5ec] ss:$16 sps:$4 sm:$0xff]  }
  0xc4   :  { %1790 = vmatprep.mubr.bf16.mxu1 %v3775_v43  ;;  %v3419_v43 = vld [vmem:[#allocation6 + $0x448] ss:$16 sps:$4 sm:$0xff]  }
  0xc5   :  { %1858 = vmatpush1.bf16.msra.mxu0 %v3404_v63  ;;  %v3434_v63 = vld [vmem:[#allocation6 + $0x3e8] ss:$16 sps:$4 sm:$0xff]  }
  0xc6   :  { %1971 = vmatpush1.bf16.msra.mxu1 %v3407_v23  ;;  %1859 = vmatprep.subr.bf16.mxu0 %v3412_v6  ;;  %v3442_v6 = vld [vmem:[#allocation6 + $0x3cc] ss:$16 sps:$4 sm:$0xff]   ;;  %v3467_v0 = vld [vmem:[#allocation6 + $0x548] ss:$16 sps:$4 sm:$0xff]  }
  0xc7   :  { %1972 = vmatprep.subr.bf16.mxu1 %v3415_v7  ;;  %v3445_v7 = vld [vmem:[#allocation6 + $0x5cc] ss:$16 sps:$4 sm:$0xff]  }
  0xc8   :  { %1678 = vmatmul.mubr.bf16.gmra.mxu0 %v3869_v11 }
  0xc9   :  { %1791 = vmatmul.mubr.bf16.gmra.mxu1 %v3783_v58  ;;  %1860 = vmatpush1.bf16.msra.mxu0 %v3410_v8  ;;  %v3425_v58 = vld [vmem:[#allocation6 + $0x428] ss:$16 sps:$4 sm:$0xff]  }
  0xca   :  { %1973 = vmatpush1.bf16.msra.mxu1 %v3413_v9  ;;  %1861 = vmatprep.subr.bf16.mxu0 %v3418_v19  ;;  %v3440_v8 = vld [vmem:[#allocation6 + $0x3c8] ss:$16 sps:$4 sm:$0xff]   ;;  %v3448_v19 = vld [vmem:[#allocation6 + $0x3ac] ss:$16 sps:$4 sm:$0xff]  }
  0xcb   :  { %1974 = vmatprep.subr.bf16.mxu1 %v3421_v20  ;;  %1687 = vmatprep.mubr.bf16.mxu0 %v3871_v27  ;;  %v3443_v9 = vld [vmem:[#allocation6 + $0x5c8] ss:$16 sps:$4 sm:$0xff]   ;;  %v3451_v20 = vld [vmem:[#allocation6 + $0x5ac] ss:$16 sps:$4 sm:$0xff]  }
  0xcc   :  { %1800 = vmatprep.mubr.bf16.mxu1 %v3787_v1  ;;  %v133_v1 = vld [vmem:[#allocation3 + $0x1a0] sm:$0xff] }
  0xcd   :  { %1862 = vmatpush1.bf16.msra.mxu0 %v3416_v21  ;;  %v3885_v23 = vpack.c.bf16 %v139_v56, %v133_v1  ;;  %v3446_v21 = vld [vmem:[#allocation6 + $0x3a8] ss:$16 sps:$4 sm:$0xff]  }
  0xce   :  { %1975 = vmatpush1.bf16.msra.mxu1 %v3419_v43  ;;  %1863 = vmatprep.subr.bf16.mxu0 %v3424_v30  ;;  %v158_v43 = vld [vmem:[#allocation3 + $0x268] sm:$0xff] }
  0xcf   :  { %1976 = vmatprep.subr.bf16.mxu1 %v3427_v33  ;;  %v3454_v30 = vld [vmem:[#allocation6 + $0x38c] ss:$16 sps:$4 sm:$0xff]   ;;  %v3895_v39 = vpack.c.bf16 %v164_v29, %v158_v43  ;;  %v3461_v1 = vld [vmem:[#allocation6 + $0x568] ss:$16 sps:$4 sm:$0xff]  }
  0xd0   :  { %1688 = vmatmul.mubr.bf16.gmra.mxu0 %v3877_v53  ;;  %v3457_v33 = vld [vmem:[#allocation6 + $0x58c] ss:$16 sps:$4 sm:$0xff]  }
  0xd1   :  { %1801 = vmatmul.mubr.bf16.gmra.mxu1 %v3795_v14  ;;  %1864 = vmatpush1.bf16.msra.mxu0 %v3422_v34  ;;  %v3437_v14 = vld [vmem:[#allocation6 + $0x5e8] ss:$16 sps:$4 sm:$0xff]   ;;  %v3487_v43 = vld [vmem:[#allocation8 + $0x64] ss:$8 sps:$4 sm:$0xff]   ;;  %v3490_v29 = vld [vmem:[#allocation8 + $0x54] ss:$8 sps:$4 sm:$0xff]  }
  0xd2   :  { %1977 = vmatpush1.bf16.msra.mxu1 %v3425_v58  ;;  %1865 = vmatprep.subr.bf16.mxu0 %v3430_v42  ;;  %v3452_v34 = vld [vmem:[#allocation6 + $0x388] ss:$16 sps:$4 sm:$0xff]   ;;  %v157_v58 = vld [vmem:[#allocation3 + $0x260] sm:$0xff]  ;;  %v163_v42 = vld [vmem:[#allocation3 + $0x290] sm:$0xff] }
  0xd3   :  { %1978 = vmatprep.subr.bf16.mxu1 %v3433_v45  ;;  %1697 = vmatprep.mubr.bf16.mxu0 %v3879_v55  ;;  %v3463_v45 = vld [vmem:[#allocation6 + $0x56c] ss:$16 sps:$4 sm:$0xff]   ;;  %v3901_v56 = vpack.c.bf16 %v163_v42, %v157_v58  ;;  %v3539_v58 = vld [vmem:[#allocation8 + $0x140] ss:$8 sps:$4 sm:$0xff]   ;;  %v3506_v42 = vld [vmem:[#allocation8 + $0xf0] ss:$8 sps:$4 sm:$0xff]  }
  0xd4   :  { %1810 = vmatprep.mubr.bf16.mxu1 %v3799_v25  ;;  %v145_v25 = vld [vmem:[#allocation3 + $0x200] sm:$0xff] }
  0xd5   :  { %1866 = vmatpush1.bf16.msra.mxu0 %v3428_v48  ;;  %v3893_v28 = vpack.c.bf16 %v151_v36, %v145_v25  ;;  %v170_v48 = vld [vmem:[#allocation3 + $0x2c8] sm:$0xff] }
  0xd6   :  { %1979 = vmatpush1.bf16.msra.mxu1 %v3431_v51  ;;  %1867 = vmatprep.subr.bf16.mxu0 %v3436_v16  ;;  %v3458_v51 = vld [vmem:[#allocation6 + $0x368] ss:$16 sps:$4 sm:$0xff]   ;;  %v3466_v16 = vld [vmem:[#allocation6 + $0x34c] ss:$16 sps:$4 sm:$0xff]  }
  0xd7   :  { %1980 = vmatprep.subr.bf16.mxu1 %v3439_v57  ;;  %v176_v57 = vld [vmem:[#allocation3 + $0x2f8] sm:$0xff] }
  0xd8   :  { %1698 = vmatmul.mubr.bf16.gmra.mxu0 %v3885_v23  ;;  %v3903_v3 = vpack.c.bf16 %v176_v57, %v170_v48  ;;  %v3478_v36 = vld [vmem:[#allocation6 + $0x30c] ss:$16 sps:$4 sm:$0xff]   ;;  %v3545_v48 = vld [vmem:[#allocation8 + $0x120] ss:$8 sps:$4 sm:$0xff]  }
  0xd9   :  { %1811 = vmatmul.mubr.bf16.gmra.mxu1 %v3807_v40  ;;  %1868 = vmatpush2.bf16.msra.mxu0 %v3434_v63  ;;  %v3449_v40 = vld [vmem:[#allocation6 + $0x5a8] ss:$16 sps:$4 sm:$0xff]  }
  0xda   :  { %1981 = vmatpush2.bf16.msra.mxu1 %v3437_v14  ;;  %1869 = vmatprep.subr.bf16.mxu0 %v3442_v6  ;;  %v3464_v63 = vld [vmem:[#allocation6 + $0x348] ss:$16 sps:$4 sm:$0xff]   ;;  %v169_v14 = vld [vmem:[#allocation3 + $0x2c0] sm:$0xff]  ;;  %v175_v6 = vld [vmem:[#allocation3 + $0x2f0] sm:$0xff] }
  0xdb   :  { %1982 = vmatprep.subr.bf16.mxu1 %v3445_v7  ;;  %1707 = vmatprep.mubr.bf16.mxu0 %v3887_v18  ;;  %v3475_v7 = vld [vmem:[#allocation6 + $0x52c] ss:$16 sps:$4 sm:$0xff]   ;;  %v3909_v25 = vpack.c.bf16 %v175_v6, %v169_v14  ;;  %v3551_v57 = vld [vmem:[#allocation8 + $0x100] ss:$8 sps:$4 sm:$0xff]  }
  0xdc   :  { %1820 = vmatprep.mubr.bf16.mxu1 %v3811_v49  ;;  %v3460_v49 = vld [vmem:[#allocation6 + $0x36c] ss:$16 sps:$4 sm:$0xff]   ;;  %v3557_v6 = vld [vmem:[#allocation8 + $0x1e0] ss:$8 sps:$4 sm:$0xff]  }
  0xdd   :  { %1870 = vmatpush2.bf16.msra.mxu0 %v3440_v8  ;;  %v3470_v8 = vld [vmem:[#allocation6 + $0x328] ss:$16 sps:$4 sm:$0xff]   ;;  %v3526_v14 = vld [vmem:[#allocation8 + $0x94] ss:$8 sps:$4 sm:$0xff]  }
  0xde   :  { %1983 = vmatpush2.bf16.msra.mxu1 %v3443_v9  ;;  %1871 = vmatprep.subr.bf16.mxu0 %v3448_v19  ;;  %v3473_v9 = vld [vmem:[#allocation6 + $0x528] ss:$16 sps:$4 sm:$0xff]   ;;  %v3481_v19 = vld [vmem:[#allocation6 + $0x50c] ss:$16 sps:$4 sm:$0xff]  }
  0xdf   :  { %1984 = vmatprep.subr.bf16.mxu1 %v3451_v20  ;;  %v3479_v20 = vld [vmem:[#allocation6 + $0x508] ss:$16 sps:$4 sm:$0xff]  }
  0xe0   :  { %1708 = vmatmul.mubr.bf16.gmra.mxu0 %v3893_v28 }
  0xe1   :  { %1821 = vmatmul.mubr.bf16.gmra.mxu1 %v3819_v4  ;;  %1872 = vmatpush2.bf16.msra.mxu0 %v3446_v21  ;;  %v3469_v4 = vld [vmem:[#allocation6 + $0x54c] ss:$16 sps:$4 sm:$0xff]   ;;  %v3482_v21 = vld [vmem:[#allocation8 + $0x70] ss:$8 sps:$4 sm:$0xff]  }
  0xe2   :  { %1985 = vmatpush2.bf16.msra.mxu1 %v3449_v40  ;;  %1873 = vmatprep.subr.bf16.mxu0 %v3454_v30  ;;  %v3499_v40 = vld [vmem:[#allocation8 + $0x24] ss:$8 sps:$4 sm:$0xff]   ;;  %v3530_v30 = vld [vmem:[#allocation8 + $0x170] ss:$8 sps:$4 sm:$0xff]  }
  0xe3   :  { %1986 = vmatprep.subr.bf16.mxu1 %v3457_v33  ;;  %1717 = vmatprep.mubr.bf16.mxu0 %v3895_v39  ;;  %v3500_v33 = vld [vmem:[#allocation8 + $0x10] ss:$8 sps:$4 sm:$0xff]  }
  0xe4   :  { %1830 = vmatprep.mubr.bf16.mxu1 %v3823_v12  ;;  %v3472_v12 = vld [vmem:[#allocation6 + $0x32c] ss:$16 sps:$4 sm:$0xff]  }
  0xe5   :  { %1874 = vmatpush2.bf16.msra.mxu0 %v3452_v34  ;;  %v3538_v34 = vld [vmem:[#allocation8 + $0x154] ss:$8 sps:$4 sm:$0xff]  }
  0xe6   :  { %1987 = vmatpush2.bf16.msra.mxu1 %v3455_v38  ;;  %1875 = vmatprep.subr.bf16.mxu0 %v3460_v49  ;;  %v3508_v38 = vld [vmem:[#allocation8 + $0xf4] ss:$8 sps:$4 sm:$0xff]  }
  0xe7   :  { %1988 = vmatprep.subr.bf16.mxu1 %v3463_v45  ;;  %v3544_v49 = vld [vmem:[#allocation8 + $0x134] ss:$8 sps:$4 sm:$0xff]  }
  0xe8   :  { %1718 = vmatmul.mubr.bf16.gmra.mxu0 %v3901_v56  ;;  %v3514_v45 = vld [vmem:[#allocation8 + $0xd4] ss:$8 sps:$4 sm:$0xff]  }
  0xe9   :  { %1831 = vmatmul.mubr.bf16.gmra.mxu1 %v3831_v31  ;;  %1876 = vmatpush2.bf16.msra.mxu0 %v3458_v51  ;;  %v3476_v31 = vld [vmem:[#allocation6 + $0x308] ss:$16 sps:$4 sm:$0xff]  }
  0xea   :  { %1989 = vmatpush2.bf16.msra.mxu1 %v3461_v1  ;;  %1877 = vmatprep.subr.bf16.mxu0 %v3466_v16  ;;  %v3512_v51 = vld [vmem:[#allocation8 + $0xd0] ss:$8 sps:$4 sm:$0xff]   ;;  %v3550_v1 = vld [vmem:[#allocation8 + $0x114] ss:$8 sps:$4 sm:$0xff]  }
  0xeb   :  { %1990 = vmatprep.subr.bf16.mxu1 %v3469_v4  ;;  %1727 = vmatprep.mubr.bf16.mxu0 %v3903_v3  ;;  %v3520_v16 = vld [vmem:[#allocation8 + $0xb4] ss:$8 sps:$4 sm:$0xff]   ;;  %v3518_v4 = vld [vmem:[#allocation8 + $0xb0] ss:$8 sps:$4 sm:$0xff]  }
  0xec   :  { %1840 = vmatprep.mubr.bf16.mxu1 %v3835_v46  ;;  %v3484_v46 = vld [vmem:[#allocation8 + $0x74] ss:$8 sps:$4 sm:$0xff]  }
  0xed   :  { %1878 = vmatpush2.bf16.msra.mxu0 %v3464_v63  ;;  %v3556_v63 = vld [vmem:[#allocation8 + $0x1f4] ss:$8 sps:$4 sm:$0xff]  }
  0xee   :  { %1991 = vmatpush2.bf16.msra.mxu1 %v3467_v0  ;;  %1879 = vmatprep.subr.bf16.mxu0 %v3472_v12  ;;  %v3559_v0 = vld [vmem:[#allocation8 + $0x1e4] ss:$8 sps:$4 sm:$0xff]  }
  0xef   :  { %1992 = vmatprep.subr.bf16.mxu1 %v3475_v7  ;;  %v3562_v7 = vld [vmem:[#allocation8 + $0x1d4] ss:$8 sps:$4 sm:$0xff]  }
  0xf0   :  { %1728 = vmatmul.mubr.bf16.gmra.mxu0 %v3909_v25 }
  0xf1   :  { %1841 = vmatmul.mubr.bf16.gmra.mxu1 %v3843_v60  ;;  %1880 = vmatpush2.bf16.msra.mxu0 %v3470_v8  ;;  %v3485_v60 = vld [vmem:[#allocation8 + $0x60] ss:$8 sps:$4 sm:$0xff]  }
  0xf2   :  { %1993 = vmatpush2.bf16.msra.mxu1 %v3473_v9  ;;  %1881 = vmatprep.subr.bf16.mxu0 %v3478_v36  ;;  %v3951_v8 = vld [vmem:[%s4411_s2] sm:$0xf]  ;;  %v3565_v36 = vld [vmem:[#allocation8 + $0x1c4] ss:$8 sps:$4 sm:$0xff]  }
  0xf3   :  { %1994 = vmatprep.subr.bf16.mxu1 %v3481_v19  ;;  %1883 = vmatprep.mubr.bf16.mxu0 %v3755_v54  ;;  %v3488_v54 = vld [vmem:[#allocation8 + $0x50] ss:$8 sps:$4 sm:$0xff]   ;;  %v3527_v9 = vld [vmem:[#allocation8 + $0x80] ss:$8 sps:$4 sm:$0xff]  }
  0xf4   :  { %1996 = vmatprep.mubr.bf16.mxu1 %v3847_v10  ;;  %v3493_v10 = vld [vmem:[#allocation8 + $0x44] ss:$8 sps:$4 sm:$0xff]  }
  0xf5   :  { %1882 = vmatpush2.bf16.msra.mxu0 %v3476_v31  ;;  %v3563_v31 = vld [vmem:[#allocation8 + $0x1c0] ss:$8 sps:$4 sm:$0xff]  }
  0xf6   :  { %1995 = vmatpush2.bf16.msra.mxu1 %v3479_v20  ;;  %2569 = vmatprep.subr.bf16.mxu0 %v3484_v46  ;;  %v3566_v46 = vld [vmem:[#allocation8 + $0x1b0] ss:$8 sps:$4 sm:$0xff]  }
  0xf8   :  { %1884 = vmatmul.mubr.bf16.vlgmr.msra.gmra.mxu0 %v3761_v17  ;;  %v3491_v17 = vld [vmem:[#allocation8 + $0x40] ss:$8 sps:$4 sm:$0xff]  }
  0xf9   :  { %1997 = vmatmul.mubr.bf16.vlgmr.msra.gmra.mxu1 %v3853_v22  ;;  %1893 = vmatprep.mubr.bf16.mxu0 %v3765_v24  ;;  %v3496_v24 = vld [vmem:[#allocation8 + $0x34] ss:$8 sps:$4 sm:$0xff]   ;;  %v3494_v22 = vld [vmem:[#allocation8 + $0x30] ss:$8 sps:$4 sm:$0xff]  }
  0xfa   :  { %2006 = vmatprep.mubr.bf16.mxu1 %v3855_v35  ;;  %2570 = vmatpush1.bf16.msra.mxu0 %v3482_v21  ;;  %v3532_v35 = vld [vmem:[#allocation8 + $0x174] ss:$8 sps:$4 sm:$0xff]  }
  0xfb   :  { %2571 = vmatprep.subr.bf16.mxu0 %v3487_v43  ;;  %2682 = vmatprep.subr.bf16.mxu1 %v3532_v35 }
  0xfc   :  { %2683 = vmatpush1.bf16.msra.mxu1 %v3530_v30 }
  0xfe   :  { %2572 = vmatpush1.bf16.msra.mxu0 %v3485_v60 }
  0xff   :  { %2573 = vmatprep.subr.bf16.mxu0 %v3490_v29 }
 0x100   :  { %1894 = vmatmul.mubr.bf16.gmra.mxu0 %v3773_v37  ;;  %v3497_v37 = vld [vmem:[#allocation8 + $0x20] ss:$8 sps:$4 sm:$0xff]  }
 0x101   :  { %2007 = vmatmul.mubr.bf16.gmra.mxu1 %v3861_v52  ;;  %1903 = vmatprep.mubr.bf16.mxu0 %v3777_v44  ;;  %v3535_v44 = vld [vmem:[#allocation8 + $0x164] ss:$8 sps:$4 sm:$0xff]   ;;  %v3502_v52 = vld [vmem:[#allocation8 + $0x14] ss:$8 sps:$4 sm:$0xff]  }
 0x102   :  { %2016 = vmatprep.mubr.bf16.mxu1 %v3863_v62  ;;  %2574 = vmatpush1.bf16.msra.mxu0 %v3488_v54  ;;  %v3533_v62 = vld [vmem:[#allocation8 + $0x160] ss:$8 sps:$4 sm:$0xff]  }
 0x103   :  { %2575 = vmatprep.subr.bf16.mxu0 %v3493_v10  ;;  %2684 = vmatprep.subr.bf16.mxu1 %v3535_v44  ;;  %v3571_v10 = vld [vmem:[#allocation8 + $0x1a4] ss:$8 sps:$4 sm:$0xff]  }
 0x104   :  { %2685 = vmatpush1.bf16.msra.mxu1 %v3533_v62  ;;  %v3572_v62 = vld [vmem:[#allocation8 + $0x190] ss:$8 sps:$4 sm:$0xff]  }
 0x105   :  { %2686 = vmatprep.subr.bf16.mxu1 %v3538_v34 }
 0x106   :  { %2576 = vmatpush1.bf16.msra.mxu0 %v3491_v17 }
 0x107   :  { %2577 = vmatprep.subr.bf16.mxu0 %v3496_v24 }
 0x108   :  { %1904 = vmatmul.mubr.bf16.gmra.mxu0 %v3785_v59  ;;  %v3505_v59 = vld [vmem:[#allocation8 + $0x4] ss:$8 sps:$4 sm:$0xff]  }
 0x109   :  { %2017 = vmatmul.mubr.bf16.gmra.mxu1 %v3869_v11  ;;  %1913 = vmatprep.mubr.bf16.mxu0 %v3789_v2  ;;  %v3536_v11 = vld [vmem:[#allocation8 + $0x150] ss:$8 sps:$4 sm:$0xff]   ;;  %v3503_v2 = vld [vmem:[#allocation8] ss:$8 sps:$4 sm:$0xff]  }
 0x10a   :  { %2026 = vmatprep.mubr.bf16.mxu1 %v3871_v27  ;;  %2578 = vmatpush1.bf16.msra.mxu0 %v3494_v22  ;;  %v3541_v27 = vld [vmem:[#allocation8 + $0x144] ss:$8 sps:$4 sm:$0xff]   ;;  %v3569_v22 = vld [vmem:[#allocation8 + $0x1a0] ss:$8 sps:$4 sm:$0xff]  }
 0x10b   :  { %2579 = vmatprep.subr.bf16.mxu0 %v3499_v40  ;;  %2687 = vmatpush1.bf16.msra.mxu1 %v3536_v11 }
 0x10c   :  { %2688 = vmatprep.subr.bf16.mxu1 %v3541_v27  ;;  %v3577_v27 = vld [vmem:[#allocation8 + $0x184] ss:$8 sps:$4 sm:$0xff]  }
 0x10e   :  { %2580 = vmatpush1.bf16.msra.mxu0 %v3497_v37 }
 0x10f   :  { %2581 = vmatprep.subr.bf16.mxu0 %v3502_v52  ;;  %2689 = vmatpush1.bf16.msra.mxu1 %v3539_v58  ;;  %v3574_v52 = vld [vmem:[#allocation8 + $0x194] ss:$8 sps:$4 sm:$0xff]  }
 0x110   :  { %1914 = vmatmul.mubr.bf16.gmra.mxu0 %v3797_v15  ;;  %v3511_v15 = vld [vmem:[#allocation8 + $0xe4] ss:$8 sps:$4 sm:$0xff]   ;;  %2690 = vmatprep.subr.bf16.mxu1 %v3544_v49 }
 0x111   :  { %2027 = vmatmul.mubr.bf16.gmra.mxu1 %v3877_v53  ;;  %1923 = vmatprep.mubr.bf16.mxu0 %v3801_v26  ;;  %v3542_v53 = vld [vmem:[#allocation8 + $0x130] ss:$8 sps:$4 sm:$0xff]   ;;  %v3509_v26 = vld [vmem:[#allocation8 + $0xe0] ss:$8 sps:$4 sm:$0xff]  }
 0x112   :  { %2036 = vmatprep.mubr.bf16.mxu1 %v3879_v55  ;;  %2582 = vmatpush1.bf16.msra.mxu0 %v3500_v33  ;;  %v3547_v55 = vld [vmem:[#allocation8 + $0x124] ss:$8 sps:$4 sm:$0xff]  }
 0x113   :  { %2583 = vmatprep.subr.bf16.mxu0 %v3505_v59  ;;  %2691 = vmatpush1.bf16.msra.mxu1 %v3542_v53 }
 0x114   :  { %2692 = vmatprep.subr.bf16.mxu1 %v3547_v55 }
 0x116   :  { %2584 = vmatpush1.bf16.msra.mxu0 %v3503_v2 }
 0x117   :  { %2585 = vmatprep.subr.bf16.mxu0 %v3508_v38  ;;  %2693 = vmatpush1.bf16.msra.mxu1 %v3545_v48 }
 0x118   :  { %1924 = vmatmul.mubr.bf16.gmra.mxu0 %v3809_v41  ;;  %v3517_v41 = vld [vmem:[#allocation8 + $0xc4] ss:$8 sps:$4 sm:$0xff]   ;;  %2694 = vmatprep.subr.bf16.mxu1 %v3550_v1 }
 0x119   :  { %2037 = vmatmul.mubr.bf16.gmra.mxu1 %v3885_v23  ;;  %1933 = vmatprep.mubr.bf16.mxu0 %v3813_v50  ;;  %v3548_v23 = vld [vmem:[#allocation8 + $0x110] ss:$8 sps:$4 sm:$0xff]   ;;  %v3515_v50 = vld [vmem:[#allocation8 + $0xc0] ss:$8 sps:$4 sm:$0xff]  }
 0x11a   :  { %2046 = vmatprep.mubr.bf16.mxu1 %v3887_v18  ;;  %2586 = vmatpush2.bf16.msra.mxu0 %v3506_v42  ;;  %v3553_v18 = vld [vmem:[#allocation8 + $0x104] ss:$8 sps:$4 sm:$0xff]   ;;  %v3575_v42 = vld [vmem:[#allocation8 + $0x180] ss:$8 sps:$4 sm:$0xff]  }
 0x11b   :  { %2587 = vmatprep.subr.bf16.mxu0 %v3511_v15  ;;  %2695 = vmatpush1.bf16.msra.mxu1 %v3548_v23 }
 0x11c   :  { %2696 = vmatprep.subr.bf16.mxu1 %v3553_v18 }
 0x11e   :  { %2588 = vmatpush2.bf16.msra.mxu0 %v3509_v26 }
 0x11f   :  { %2589 = vmatprep.subr.bf16.mxu0 %v3514_v45  ;;  %2697 = vmatpush1.bf16.msra.mxu1 %v3551_v57 }
 0x120   :  { %1934 = vmatmul.mubr.bf16.gmra.mxu0 %v3821_v5  ;;  %v3523_v5 = vld [vmem:[#allocation8 + $0xa4] ss:$8 sps:$4 sm:$0xff]   ;;  %2698 = vmatprep.subr.bf16.mxu1 %v3556_v63 }
 0x121   :  { %2047 = vmatmul.mubr.bf16.gmra.mxu1 %v3893_v28  ;;  %1943 = vmatprep.mubr.bf16.mxu0 %v3825_v13  ;;  %v3554_v28 = vld [vmem:[#allocation8 + $0x1f0] ss:$8 sps:$4 sm:$0xff]   ;;  %v419_v13 = vlaneseq }
 0x122   :  { %2056 = vmatprep.mubr.bf16.mxu1 %v3895_v39  ;;  %2590 = vmatpush2.bf16.msra.mxu0 %v3512_v51  ;;  %v3521_v39 = vld [vmem:[#allocation8 + $0xa0] ss:$8 sps:$4 sm:$0xff]  }
 0x123   :  { %2591 = vmatprep.subr.bf16.mxu0 %v3517_v41  ;;  %2699 = vmatpush2.bf16.msra.mxu1 %v3554_v28  ;;  %v3943_v12 = vshrl.u32 %v419_v13, 7 }
 0x124   :  { %2700 = vmatprep.subr.bf16.mxu1 %v3559_v0 }
 0x125   :  { %4421 = vst [vmem:[#allocation16_spill] sm:$0xff] %v3943_v12  ;;  %v4417_v19 = vsub.s32 1, %v3943_v12 }
 0x126   :  { %2592 = vmatpush2.bf16.msra.mxu0 %v3515_v50 }
 0x127   :  { %2593 = vmatprep.subr.bf16.mxu0 %v3520_v16  ;;  %2701 = vmatpush2.bf16.msra.mxu1 %v3557_v6  ;;  %v3962_v20 = vrot.slane %v3951_v8, %v4417_v19 }
 0x128   :  { %1944 = vmatmul.mubr.bf16.gmra.mxu0 %v3833_v32  ;;  %v3524_v32 = vld [vmem:[#allocation8 + $0x90] ss:$8 sps:$4 sm:$0xff]   ;;  %2702 = vmatprep.subr.bf16.mxu1 %v3562_v7 }
 0x129   :  { %2057 = vmatmul.mubr.bf16.gmra.mxu1 %v3901_v56  ;;  %1953 = vmatprep.mubr.bf16.mxu0 %v3837_v47  ;;  %v3529_v56 = vld [vmem:[#allocation8 + $0x84] ss:$8 sps:$4 sm:$0xff]   ;;  %v3560_v47 = vld [vmem:[#allocation8 + $0x1d0] ss:$8 sps:$4 sm:$0xff]  }
 0x12a   :  { %2066 = vmatprep.mubr.bf16.mxu1 %v3903_v3  ;;  %2594 = vmatpush2.bf16.msra.mxu0 %v3518_v4  ;;  %v4418_v3 = vsub.s32 0, %v3943_v12 }
 0x12b   :  { %2595 = vmatprep.subr.bf16.mxu0 %v3523_v5  ;;  %2703 = vmatpush2.bf16.msra.mxu1 %v3560_v47 }
 0x12c   :  { %2704 = vmatprep.subr.bf16.mxu1 %v3565_v36 }
 0x12e   :  { %2596 = vmatpush2.bf16.msra.mxu0 %v3521_v39 }
 0x12f   :  { %2597 = vmatprep.subr.bf16.mxu0 %v3526_v14  ;;  %2705 = vmatpush2.bf16.msra.mxu1 %v3563_v31 }
 0x130   :  { %1954 = vmatmul.mubr.bf16.gmra.mxu0 %v3845_v61  ;;  %v3957_v61 = vrot.slane %v3951_v8, %v4418_v3 }
 0x131   :  { %2067 = vmatmul.mubr.bf16.gmra.mxu1 %v3909_v25  ;;  %v3568_v25 = vld [vmem:[#allocation8 + $0x1b4] ss:$8 sps:$4 sm:$0xff]  }
 0x132   :  { %2598 = vmatpush2.bf16.msra.mxu0 %v3524_v32  ;;  %2706 = vmatprep.subr.bf16.mxu1 %v3568_v25 }
 0x133   :  { %2599 = vmatprep.subr.bf16.mxu0 %v3529_v56  ;;  %2707 = vmatpush2.bf16.msra.mxu1 %v3566_v46 }
 0x134   :  { %2708 = vmatprep.subr.bf16.mxu1 %v3571_v10 }
 0x136   :  { %2600 = vmatpush2.bf16.msra.mxu0 %v3527_v9 }
 0x137   :  { %2709 = vmatpush2.bf16.msra.mxu1 %v3569_v22 }
 0x138   :  { %v1433_v21 = vpop.f32.mrf.mxu0  ;;  %2710 = vmatprep.subr.bf16.mxu1 %v3574_v52 }
 0x139   :  { %v1546_v43 = vpop.f32.mrf.mxu1  ;;  %v1434_v60 = vadd.f32 %v1433_v21, %v3957_v61 }
 0x13a   :  { %v1435_v29 = vpop.f32.mrf.mxu0 }
 0x13b   :  { %v1548_v54 = vpop.f32.mrf.mxu1  ;;  %v3965_v17 = vadd.f32 %v1546_v43, %v1434_v60  ;;  %v1436_v24 = vadd.f32 %v1435_v29, %v3962_v20  ;;  %2711 = vmatpush2.bf16.msra.mxu1 %v3572_v62 }
 0x13c   :  { %v3968_v35 = vpop.f32.mrf.mxu0  ;;  %2712 = vmatprep.subr.bf16.mxu1 %v3577_v27 }
 0x13d   :  { %v3970_v40 = vpop.f32.mrf.mxu1  ;;  %v3972_v30 = vadd.f32 %v1548_v54, %v1436_v24 }
 0x13e   :  { %v3974_v37 = vpop.f32.mrf.mxu0 }
 0x13f   :  { %v3976_v44 = vpop.f32.mrf.mxu1  ;;  %2713 = vmatpush2.bf16.msra.mxu1 %v3575_v42  ;;  %v1440_v19 = vadd.f32 %v3974_v37, %v3962_v20 }
 0x140   :  { %v1443_v33 = vpop.f32.mrf.mxu0 }
 0x141   :  { %v1556_v34 = vpop.f32.mrf.mxu1  ;;  %v1444_v59 = vadd.f32 %v1443_v33, %v3957_v61 }
 0x142   :  { %v1445_v11 = vpop.f32.mrf.mxu0 }
 0x143   :  { %v1558_v2 = vpop.f32.mrf.mxu1  ;;  %v3979_v38 = vadd.f32 %v1556_v34, %v1444_v59  ;;  %v1446_v58 = vadd.f32 %v1445_v11, %v3962_v20 }
 0x144   :  { %v3982_v49 = vpop.f32.mrf.mxu0 }
 0x145   :  { %v3984_v15 = vpop.f32.mrf.mxu1  ;;  %v3986_v53 = vadd.f32 %v1558_v2, %v1446_v58 }
 0x146   :  { %v3988_v26 = vpop.f32.mrf.mxu0 }
 0x147   :  { %v3990_v55 = vpop.f32.mrf.mxu1 }
 0x148   :  { %v1453_v45 = vpop.f32.mrf.mxu0 }
 0x149   :  { %v1566_v48 = vpop.f32.mrf.mxu1  ;;  %v1454_v51 = vadd.f32 %v1453_v45, %v3957_v61 }
 0x14a   :  { %v1455_v1 = vpop.f32.mrf.mxu0 }
 0x14b   :  { %v1568_v41 = vpop.f32.mrf.mxu1  ;;  %v3993_v23 = vadd.f32 %v1566_v48, %v1454_v51  ;;  %v1456_v50 = vadd.f32 %v1455_v1, %v3962_v20 }
 0x14c   :  { %v3996_v18 = vpop.f32.mrf.mxu0 }
 0x14d   :  { %v3998_v16 = vpop.f32.mrf.mxu1  ;;  %v4000_v57 = vadd.f32 %v1568_v41, %v1456_v50 }
 0x14e   :  { %v4002_v4 = vpop.f32.mrf.mxu0 }
 0x14f   :  { %v4004_v63 = vpop.f32.mrf.mxu1 }
 0x150   :  { %v1463_v5 = vpop.f32.mrf.mxu0 }
 0x151   :  { %v1576_v28 = vpop.f32.mrf.mxu1  ;;  %v1464_v13 = vadd.f32 %v1463_v5, %v3957_v61 }
 0x152   :  { %v1465_v39 = vpop.f32.mrf.mxu0 }
 0x153   :  { %v1578_v0 = vpop.f32.mrf.mxu1  ;;  %v4007_v14 = vadd.f32 %v1576_v28, %v1464_v13  ;;  %v1466_v6 = vadd.f32 %v1465_v39, %v3962_v20 }
 0x154   :  { %v4010_v32 = vpop.f32.mrf.mxu0 }
 0x155   :  { %v4012_v7 = vpop.f32.mrf.mxu1  ;;  %v4014_v56 = vadd.f32 %v1578_v0, %v1466_v6 }
 0x156   :  { %v4016_v47 = vpop.f32.mrf.mxu0 }
 0x157   :  { %v4018_v9 = vpop.f32.mrf.mxu1 }
 0x158   :  { %v1473_v36 = vpop.f32.mrf.mxu0 }
 0x159   :  { %v1586_v31 = vpop.f32.mrf.mxu1  ;;  %v1474_v25 = vadd.f32 %v1473_v36, %v3957_v61 }
 0x15a   :  { %v4021_v46 = vpop.f32.mrf.mxu0 }
 0x15b   :  { %v4023_v21 = vpop.f32.mrf.mxu1  ;;  %v4025_v43 = vadd.f32 %v1586_v31, %v1474_v25 }
 0x15c   :  { %v4027_v60 = vpop.f32.mrf.mxu0 }
 0x15d   :  { %v4029_v29 = vpop.f32.mrf.mxu1 }
 0x15e   :  { %v4031_v54 = vpop.f32.mrf.mxu0 }
 0x15f   :  { %v4033_v10 = vpop.f32.mrf.mxu1 }
 0x160   :  { %v1483_v24 = vpop.f32.mrf.mxu0 }
 0x161   :  { %v1596_v22 = vpop.f32.mrf.mxu1  ;;  %v1484_v52 = vadd.f32 %v1483_v24, %v3957_v61  ;;  %v429_v24 = vsub.s32 2, %v3943_v12 }
 0x162   :  { %v1485_v62 = vpop.f32.mrf.mxu0 }
 0x163   :  { %v1598_v33 = vpop.f32.mrf.mxu1  ;;  %v4036_v34 = vadd.f32 %v1596_v22, %v1484_v52  ;;  %v1486_v59 = vadd.f32 %v1485_v62, %v3962_v20 }
 0x164   :  { %v4039_v11 = vpop.f32.mrf.mxu0 }
 0x165   :  { %v4041_v2 = vpop.f32.mrf.mxu1  ;;  %v4043_v27 = vadd.f32 %v1598_v33, %v1486_v59  ;;  %v433_v59 = vsub.s32 3, %v3943_v12 }
 0x166   :  { %v4045_v58 = vpop.f32.mrf.mxu0 }
 0x167   :  { %v4047_v42 = vpop.f32.mrf.mxu1 }
 0x168   :  { %v1493_v45 = vpop.f32.mrf.mxu0 }
 0x169   :  { %v1606_v48 = vpop.f32.mrf.mxu1  ;;  %v1494_v51 = vadd.f32 %v1493_v45, %v3957_v61 }
 0x16a   :  { %v1495_v1 = vpop.f32.mrf.mxu0 }
 0x16b   :  { %v1608_v41 = vpop.f32.mrf.mxu1  ;;  %v4050_v50 = vadd.f32 %v1606_v48, %v1494_v51  ;;  %v1496_v5 = vadd.f32 %v1495_v1, %v3962_v20  ;;  %v4076_v1 = vrot.slane %v3951_v8, %v429_v24 }
 0x16c   :  { %v4053_v28 = vpop.f32.mrf.mxu0 }
 0x16d   :  { %v4055_v13 = vpop.f32.mrf.mxu1  ;;  %v4057_v39 = vadd.f32 %v1608_v41, %v1496_v5 }
 0x16e   :  { %v4059_v0 = vpop.f32.mrf.mxu0 }
 0x16f   :  { %v4061_v6 = vpop.f32.mrf.mxu1 }
 0x170   :  { %v1503_v36 = vpop.f32.mrf.mxu0 }
 0x171   :  { %v1616_v31 = vpop.f32.mrf.mxu1  ;;  %v1504_v25 = vadd.f32 %v1503_v36, %v3957_v61  ;;  %v1438_v36 = vadd.f32 %v3968_v35, %v3957_v61 }
 0x172   :  { %v1505_v22 = vpop.f32.mrf.mxu0 }
 0x173   :  { %v1618_v52 = vpop.f32.mrf.mxu1  ;;  %v4065_v62 = vadd.f32 %v1616_v31, %v1504_v25  ;;  %v1506_v33 = vadd.f32 %v1505_v22, %v3962_v20  ;;  %v4085_v31 = vrot.slane %v3951_v8, %v433_v59  ;;  %v1551_v3 = vadd.f32 %v3970_v40, %v1438_v36 }
 0x174   :  { %v4069_v45 = vpop.f32.mrf.mxu0  ;;  %v1553_v8 = vadd.f32 %v3976_v44, %v1440_v19 }
 0x175   :  { %4422 = vst [vmem:[#allocation17_spill] sm:$0xff] %v4065_v62  ;;  %v4071_v48 = vpop.f32.mrf.mxu1  ;;  %v4073_v51 = vadd.f32 %v1618_v52, %v1506_v33 }
 0x176   :  { %4423 = vst [vmem:[#allocation18_spill] sm:$0xff] %v4071_v48  ;;  %v4078_v41 = vpop.f32.mrf.mxu0 }
 0x177   :  { %4424 = vst [vmem:[#allocation19_spill] sm:$0xff] %v4073_v51  ;;  %v4080_v5 = vpop.f32.mrf.mxu1 }
 0x178   :  { %4425 = vst [vmem:[#allocation20_spill] sm:$0xff] %v4080_v5  ;;  %v1659_v25 = vpop.f32.mrf.mxu0 }
 0x179   :  { %v1772_v22 = vpop.f32.mrf.mxu1  ;;  %v1660_v37 = vadd.f32 %v1659_v25, %v3965_v17 }
 0x17a   :  { %v4090_v52 = vadd.f32 %v1772_v22, %v4076_v1  ;;  %v1661_v24 = vpop.f32.mrf.mxu0 }
 0x17b   :  { %v1774_v33 = vpop.f32.mrf.mxu1  ;;  %v1662_v59 = vadd.f32 %v1661_v24, %v3972_v30 }
 0x17c   :  { %4426 = vst [vmem:[#allocation21_spill] sm:$0xff] %v4090_v52  ;;  %v4094_v12 = vadd.f32 %v1774_v33, %v4085_v31  ;;  %v1663_v62 = vpop.f32.mrf.mxu0  ;;  %v1448_v52 = vadd.f32 %v3982_v49, %v3957_v61 }
 0x17d   :  { %v4096_v35 = vpop.f32.mrf.mxu1  ;;  %v1664_v51 = vadd.f32 %v1663_v62, %v1551_v3  ;;  %v2078_v48 = vmax.f32 %v1662_v59, 0.0  ;;  %v2077_v3 = vmax.f32 %v1660_v37, 0.0 }
 0x17e   :  { %4427 = vst [vmem:[#allocation22_spill] sm:$0xff] %v4094_v12  ;;  %4428 = vst [vmem:[#allocation23_spill] sm:$0xff] %v4096_v35  ;;  %v1665_v5 = vpop.f32.mrf.mxu0  ;;  %v1450_v35 = vadd.f32 %v3988_v26, %v3962_v20  ;;  %v1561_v62 = vadd.f32 %v3984_v15, %v1448_v52  ;;  %v1458_v15 = vadd.f32 %v3996_v18, %v3957_v61 }
 0x17f   :  { %v4101_v22 = vpop.f32.mrf.mxu1  ;;  %v1666_v40 = vadd.f32 %v1665_v5, %v1553_v8  ;;  %v2081_v36 = vmax.f32 %v1664_v51, 0.0 }
 0x180   :  { %v1669_v33 = vpop.f32.mrf.mxu0  ;;  %v1563_v26 = vadd.f32 %v3990_v55, %v1450_v35  ;;  %v1460_v55 = vadd.f32 %v4002_v4, %v3962_v20 }
 0x181   :  { %v1782_v12 = vpop.f32.mrf.mxu1  ;;  %v2082_v19 = vmax.f32 %v1666_v40, 0.0  ;;  %v2141_v51 = vpack.c.bf16 %v2081_v36, %v2077_v3 }
 0x182   :  { %v4108_v30 = vadd.f32 %v1782_v12, %v4076_v1  ;;  %v1671_v17 = vpop.f32.mrf.mxu0  ;;  %v1670_v12 = vadd.f32 %v1669_v33, %v3979_v38  ;;  %v1573_v4 = vadd.f32 %v4004_v63, %v1460_v55  ;;  %v1470_v63 = vadd.f32 %v4016_v47, %v3962_v20 }
 0x183   :  { %v1784_v44 = vpop.f32.mrf.mxu1  ;;  %v2142_v25 = vpack.c.bf16 %v2082_v19, %v2078_v48  ;;  %v1672_v8 = vadd.f32 %v1671_v17, %v3986_v53 }
 0x184   :  { %v4112_v49 = vadd.f32 %v1784_v44, %v4085_v31  ;;  %v1673_v5 = vpop.f32.mrf.mxu0  ;;  %v2085_v38 = vmax.f32 %v1670_v12, 0.0  ;;  %v1571_v44 = vadd.f32 %v3998_v16, %v1458_v15  ;;  %v1468_v16 = vadd.f32 %v4010_v32, %v3957_v61 }
 0x185   :  { %v4114_v24 = vpop.f32.mrf.mxu1  ;;  %v1674_v59 = vadd.f32 %v1673_v5, %v1561_v62  ;;  %2601 = vmatprep.mubr.bf16.mxu0 %v2142_v25  ;;  %v2086_v35 = vmax.f32 %v1672_v8, 0.0  ;;  %v1583_v47 = vadd.f32 %v4018_v9, %v1470_v63 }
 0x186   :  { %v1675_v37 = vpop.f32.mrf.mxu0  ;;  %2602 = vmatmul.mubr.bf16.vlgmr.msra.gmra.mxu0 %v2141_v51 }
 0x187   :  { %v4119_v40 = vpop.f32.mrf.mxu1  ;;  %v1676_v48 = vadd.f32 %v1675_v37, %v1563_v26  ;;  %v2089_v52 = vmax.f32 %v1674_v59, 0.0 }
 0x188   :  { %v1679_v36 = vpop.f32.mrf.mxu0 }
 0x189   :  { %v1792_v19 = vpop.f32.mrf.mxu1  ;;  %v2090_v53 = vmax.f32 %v1676_v48, 0.0  ;;  %v2145_v25 = vpack.c.bf16 %v2089_v52, %v2085_v38  ;;  %v1680_v59 = vadd.f32 %v1679_v36, %v3993_v23  ;;  %v1581_v38 = vadd.f32 %v4012_v7, %v1468_v16 }
 0x18a   :  { %v4126_v3 = vadd.f32 %v1792_v19, %v4076_v1  ;;  %v1681_v33 = vpop.f32.mrf.mxu0  ;;  %v1476_v7 = vadd.f32 %v4021_v46, %v3962_v20 }
 0x18b   :  { %v1794_v17 = vpop.f32.mrf.mxu1  ;;  %v2146_v62 = vpack.c.bf16 %v2090_v53, %v2086_v35  ;;  %v1682_v26 = vadd.f32 %v1681_v33, %v4000_v57  ;;  %v2093_v23 = vmax.f32 %v1680_v59, 0.0  ;;  %v1478_v59 = vadd.f32 %v4027_v60, %v3957_v61 }
 0x18c   :  { %v4130_v18 = vadd.f32 %v1794_v17, %v4085_v31  ;;  %v1683_v51 = vpop.f32.mrf.mxu0  ;;  %v1589_v46 = vadd.f32 %v4023_v21, %v1476_v7  ;;  %v1488_v21 = vadd.f32 %v4039_v11, %v3957_v61  ;;  %v1490_v7 = vadd.f32 %v4045_v58, %v3962_v20 }
 0x18d   :  { %v4132_v5 = vpop.f32.mrf.mxu1  ;;  %v1684_v8 = vadd.f32 %v1683_v51, %v1571_v44  ;;  %2611 = vmatprep.mubr.bf16.mxu0 %v2146_v62  ;;  %v2094_v55 = vmax.f32 %v1682_v26, 0.0 }
 0x18e   :  { %v1685_v12 = vpop.f32.mrf.mxu0  ;;  %2612 = vmatmul.mubr.bf16.gmra.mxu0 %v2145_v25  ;;  %v1603_v58 = vadd.f32 %v4047_v42, %v1490_v7  ;;  %v1500_v42 = vadd.f32 %v4059_v0, %v3962_v20 }
 0x18f   :  { %v4137_v37 = vpop.f32.mrf.mxu1  ;;  %v1686_v15 = vadd.f32 %v1685_v12, %v1573_v4  ;;  %v2097_v48 = vmax.f32 %v1684_v8, 0.0 }
 0x190   :  { %v1689_v52 = vpop.f32.mrf.mxu0  ;;  %v1613_v0 = vadd.f32 %v4061_v6, %v1500_v42  ;;  %v1510_v6 = vadd.f32 %v4078_v41, %v3962_v20  ;;  %v4431_v41 = vld [vmem:[#allocation19_spill] sm:$0xff] }
 0x191   :  { %v1802_v19 = vpop.f32.mrf.mxu1  ;;  %v2098_v57 = vmax.f32 %v1686_v15, 0.0  ;;  %v2149_v17 = vpack.c.bf16 %v2097_v48, %v2093_v23  ;;  %v1690_v4 = vadd.f32 %v1689_v52, %v4007_v14 }
 0x192   :  { %v4144_v35 = vadd.f32 %v1802_v19, %v4076_v1  ;;  %v1691_v36 = vpop.f32.mrf.mxu0 }
 0x193   :  { %v1804_v53 = vpop.f32.mrf.mxu1  ;;  %v2150_v33 = vpack.c.bf16 %v2098_v57, %v2094_v55  ;;  %v1692_v25 = vadd.f32 %v1691_v36, %v4014_v56  ;;  %v1480_v56 = vadd.f32 %v4031_v54, %v3962_v20  ;;  %v2101_v52 = vmax.f32 %v1690_v4, 0.0 }
 0x194   :  { %v4148_v32 = vadd.f32 %v1804_v53, %v4085_v31  ;;  %v1693_v44 = vpop.f32.mrf.mxu0  ;;  %v1591_v57 = vadd.f32 %v4029_v29, %v1478_v59 }
 0x195   :  { %v4150_v62 = vpop.f32.mrf.mxu1  ;;  %v1694_v51 = vadd.f32 %v1693_v44, %v1581_v38  ;;  %2621 = vmatprep.mubr.bf16.mxu0 %v2150_v33  ;;  %v2102_v48 = vmax.f32 %v1692_v25, 0.0  ;;  %v1593_v54 = vadd.f32 %v4033_v10, %v1480_v56 }
 0x196   :  { %v1695_v26 = vpop.f32.mrf.mxu0  ;;  %2622 = vmatmul.mubr.bf16.gmra.mxu0 %v2149_v17 }
 0x197   :  { %v4155_v8 = vpop.f32.mrf.mxu1  ;;  %v1696_v12 = vadd.f32 %v1695_v26, %v1583_v47  ;;  %v2105_v16 = vmax.f32 %v1694_v51, 0.0 }
 0x198   :  { %v1699_v15 = vpop.f32.mrf.mxu0 }
 0x199   :  { %v1812_v9 = vpop.f32.mrf.mxu1  ;;  %v2106_v19 = vmax.f32 %v1696_v12, 0.0  ;;  %v2153_v36 = vpack.c.bf16 %v2105_v16, %v2101_v52  ;;  %v1700_v44 = vadd.f32 %v1699_v15, %v4025_v43 }
 0x19a   :  { %v4164_v14 = vadd.f32 %v1812_v9, %v4076_v1  ;;  %v1701_v63 = vpop.f32.mrf.mxu0  ;;  %v1601_v9 = vadd.f32 %v4041_v2, %v1488_v21  ;;  %v1498_v2 = vadd.f32 %v4053_v28, %v3957_v61 }
 0x19b   :  { %v1814_v55 = vpop.f32.mrf.mxu1  ;;  %v2154_v60 = vpack.c.bf16 %v2106_v19, %v2102_v48  ;;  %v1702_v33 = vadd.f32 %v1701_v63, %v1589_v46  ;;  %v2109_v43 = vmax.f32 %v1700_v44, 0.0 }
 0x19c   :  { %v4169_v23 = vadd.f32 %v1814_v55, %v4085_v31  ;;  %v1703_v53 = vpop.f32.mrf.mxu0 }
 0x19d   :  { %v4171_v38 = vpop.f32.mrf.mxu1  ;;  %v1704_v17 = vadd.f32 %v1703_v53, %v1591_v57  ;;  %2631 = vmatprep.mubr.bf16.mxu0 %v2154_v60  ;;  %v2110_v10 = vmax.f32 %v1702_v33, 0.0 }
 0x19e   :  { %v1705_v47 = vpop.f32.mrf.mxu0  ;;  %2632 = vmatmul.mubr.bf16.gmra.mxu0 %v2153_v36 }
 0x19f   :  { %v4175_v25 = vpop.f32.mrf.mxu1  ;;  %v1706_v29 = vadd.f32 %v1705_v47, %v1593_v54  ;;  %v2113_v51 = vmax.f32 %v1704_v17, 0.0 }
 0x1a0   :  { %v1709_v4 = vpop.f32.mrf.mxu0 }
 0x1a1   :  { %v1822_v26 = vpop.f32.mrf.mxu1  ;;  %v2114_v59 = vmax.f32 %v1706_v29, 0.0  ;;  %v2157_v48 = vpack.c.bf16 %v2113_v51, %v2109_v43  ;;  %v1710_v46 = vadd.f32 %v1709_v4, %v4036_v34  ;;  %v1611_v29 = vadd.f32 %v4055_v13, %v1498_v2 }
 0x1a2   :  { %v4182_v12 = vadd.f32 %v1822_v26, %v4076_v1  ;;  %v1711_v16 = vpop.f32.mrf.mxu0  ;;  %v1508_v13 = vadd.f32 %v4069_v45, %v3957_v61 }
 0x1a3   :  { %v1824_v15 = vpop.f32.mrf.mxu1  ;;  %v2158_v56 = vpack.c.bf16 %v2114_v59, %v2110_v10  ;;  %v1712_v63 = vadd.f32 %v1711_v16, %v4043_v27  ;;  %v2117_v34 = vmax.f32 %v1710_v46, 0.0 }
 0x1a4   :  { %v4186_v11 = vadd.f32 %v1824_v15, %v4085_v31  ;;  %v1713_v19 = vpop.f32.mrf.mxu0 }
 0x1a5   :  { %v4188_v52 = vpop.f32.mrf.mxu1  ;;  %v1714_v55 = vadd.f32 %v1713_v19, %v1601_v9  ;;  %2641 = vmatprep.mubr.bf16.mxu0 %v2158_v56  ;;  %v2118_v17 = vmax.f32 %v1712_v63, 0.0 }
 0x1a6   :  { %v1715_v57 = vpop.f32.mrf.mxu0  ;;  %2642 = vmatmul.mubr.bf16.gmra.mxu0 %v2157_v48 }
 0x1a7   :  { %v4193_v60 = vpop.f32.mrf.mxu1  ;;  %v1716_v36 = vadd.f32 %v1715_v57, %v1603_v58  ;;  %v2121_v53 = vmax.f32 %v1714_v55, 0.0  ;;  %v4429_v57 = vld [vmem:[#allocation18_spill] sm:$0xff] }
 0x1a8   :  { %v1719_v54 = vpop.f32.mrf.mxu0  ;;  %v1621_v2 = vadd.f32 %v4429_v57, %v1508_v13 }
 0x1a9   :  { %v1832_v33 = vpop.f32.mrf.mxu1  ;;  %v2122_v27 = vmax.f32 %v1716_v36, 0.0  ;;  %v2161_v4 = vpack.c.bf16 %v2121_v53, %v2117_v34  ;;  %v1720_v43 = vadd.f32 %v1719_v54, %v4050_v50 }
 0x1aa   :  { %v4200_v44 = vadd.f32 %v1832_v33, %v4076_v1  ;;  %v1721_v47 = vpop.f32.mrf.mxu0  ;;  %v4430_v33 = vld [vmem:[#allocation20_spill] sm:$0xff] }
 0x1ab   :  { %v1834_v21 = vpop.f32.mrf.mxu1  ;;  %v2162_v51 = vpack.c.bf16 %v2122_v27, %v2118_v17  ;;  %v1722_v10 = vadd.f32 %v1721_v47, %v4057_v39  ;;  %v2125_v50 = vmax.f32 %v1720_v43, 0.0  ;;  %v1623_v20 = vadd.f32 %v4430_v33, %v1510_v6  ;;  %v4432_v27 = vld [vmem:[#allocation17_spill] sm:$0xff] }
 0x1ac   :  { %v4204_v28 = vadd.f32 %v1834_v21, %v4085_v31  ;;  %v1723_v26 = vpop.f32.mrf.mxu0 }
 0x1ad   :  { %v4206_v7 = vpop.f32.mrf.mxu1  ;;  %v1724_v59 = vadd.f32 %v1723_v26, %v1611_v29  ;;  %2651 = vmatprep.mubr.bf16.mxu0 %v2162_v51  ;;  %v2126_v58 = vmax.f32 %v1722_v10, 0.0 }
 0x1ae   :  { %v1725_v16 = vpop.f32.mrf.mxu0  ;;  %2652 = vmatmul.mubr.bf16.gmra.mxu0 %v2161_v4 }
 0x1af   :  { %v4211_v15 = vpop.f32.mrf.mxu1  ;;  %v1726_v9 = vadd.f32 %v1725_v16, %v1613_v0  ;;  %v2129_v56 = vmax.f32 %v1724_v59, 0.0  ;;  %v4433_v59 = vld [vmem:[#allocation21_spill] sm:$0xff] }
 0x1b0   :  { %v1729_v48 = vpop.f32.mrf.mxu0 }
 0x1b1   :  { %v1842_v19 = vpop.f32.mrf.mxu1  ;;  %v2130_v39 = vmax.f32 %v1726_v9, 0.0  ;;  %v2165_v45 = vpack.c.bf16 %v2129_v56, %v2125_v50  ;;  %v1730_v34 = vadd.f32 %v1729_v48, %v4432_v27  ;;  %v4434_v56 = vld [vmem:[#allocation23_spill] sm:$0xff]  ;;  %v4435_v48 = vld [vmem:[#allocation22_spill] sm:$0xff] }
 0x1b2   :  { %v4218_v63 = vadd.f32 %v1842_v19, %v4076_v1  ;;  %v1731_v55 = vpop.f32.mrf.mxu0  ;;  %v1777_v19 = vadd.f32 %v4434_v56, %v4076_v1 }
 0x1b3   :  { %v1844_v46 = vpop.f32.mrf.mxu1  ;;  %v2166_v36 = vpack.c.bf16 %v2130_v39, %v2126_v58  ;;  %v1732_v42 = vadd.f32 %v1731_v55, %v4431_v41  ;;  %v2133_v16 = vmax.f32 %v1730_v34, 0.0 }
 0x1b4   :  { %v4222_v61 = vadd.f32 %v1844_v46, %v4085_v31  ;;  %v1733_v53 = vpop.f32.mrf.mxu0  ;;  %v1779_v46 = vadd.f32 %v4101_v22, %v4085_v31 }
 0x1b5   :  { %v4224_v54 = vpop.f32.mrf.mxu1  ;;  %v1734_v17 = vadd.f32 %v1733_v53, %v1621_v2  ;;  %2661 = vmatprep.mubr.bf16.mxu0 %v2166_v36  ;;  %v2134_v0 = vmax.f32 %v1732_v42, 0.0 }
 0x1b6   :  { %v1735_v47 = vpop.f32.mrf.mxu0  ;;  %2662 = vmatmul.mubr.bf16.gmra.mxu0 %v2165_v45 }
 0x1b7   :  { %v4229_v21 = vpop.f32.mrf.mxu1  ;;  %v1736_v29 = vadd.f32 %v1735_v47, %v1623_v20  ;;  %v2137_v51 = vmax.f32 %v1734_v17, 0.0 }
 0x1b8   :  { %v1885_v4 = vpop.f32.mrf.mxu0 }
 0x1b9   :  { %v1998_v26 = vpop.f32.mrf.mxu1  ;;  %v2138_v10 = vmax.f32 %v1736_v29, 0.0  ;;  %v1886_v43 = vadd.f32 %v1885_v4, %v4433_v59  ;;  %v2169_v39 = vpack.c.bf16 %v2137_v51, %v2133_v16  ;;  %v1787_v29 = vadd.f32 %v4114_v24, %v4076_v1 }
 0x1ba   :  { %v1887_v13 = vpop.f32.mrf.mxu0  ;;  %v1789_v16 = vadd.f32 %v4119_v40, %v4085_v31  ;;  %v1797_v40 = vadd.f32 %v4132_v5, %v4076_v1 }
 0x1bb   :  { %v2000_v9 = vpop.f32.mrf.mxu1  ;;  %v2170_v6 = vpack.c.bf16 %v2138_v10, %v2134_v0  ;;  %v1888_v58 = vadd.f32 %v1887_v13, %v4435_v48  ;;  %v1999_v57 = vadd.f32 %v1998_v26, %v1886_v43 }
 0x1bc   :  { %v1889_v50 = vpop.f32.mrf.mxu0 }
 0x1bd   :  { %v2002_v55 = vpop.f32.mrf.mxu1  ;;  %v1890_v2 = vadd.f32 %v1889_v50, %v1777_v19  ;;  %2671 = vmatprep.mubr.bf16.mxu0 %v2170_v6  ;;  %v2001_v53 = vadd.f32 %v2000_v9, %v1888_v58  ;;  %v2079_v17 = vmax.f32 %v1999_v57, 0.0 }
 0x1be   :  { %v1891_v36 = vpop.f32.mrf.mxu0  ;;  %2672 = vmatmul.mubr.bf16.gmra.mxu0 %v2169_v39 }
 0x1bf   :  { %v2004_v45 = vpop.f32.mrf.mxu1  ;;  %v2003_v33 = vadd.f32 %v2002_v55, %v1890_v2  ;;  %v1892_v20 = vadd.f32 %v1891_v36, %v1779_v46  ;;  %v2080_v4 = vmax.f32 %v2001_v53, 0.0 }
 0x1c0   :  { %v1895_v41 = vpop.f32.mrf.mxu0 }
 0x1c1   :  { %v2008_v42 = vpop.f32.mrf.mxu1  ;;  %v2083_v27 = vmax.f32 %v2003_v33, 0.0  ;;  %v2005_v34 = vadd.f32 %v2004_v45, %v1892_v20  ;;  %v1896_v47 = vadd.f32 %v1895_v41, %v4108_v30 }
 0x1c2   :  { %v1897_v22 = vpop.f32.mrf.mxu0 }
 0x1c3   :  { %v2010_v51 = vpop.f32.mrf.mxu1  ;;  %v2143_v26 = vpack.c.bf16 %v2083_v27, %v2079_v17  ;;  %v2084_v0 = vmax.f32 %v2005_v34, 0.0  ;;  %v1898_v10 = vadd.f32 %v1897_v22, %v4112_v49  ;;  %v2009_v9 = vadd.f32 %v2008_v42, %v1896_v47 }
 0x1c4   :  { %v1899_v59 = vpop.f32.mrf.mxu0  ;;  %v1799_v42 = vadd.f32 %v4137_v37, %v4085_v31  ;;  %v1807_v37 = vadd.f32 %v4150_v62, %v4076_v1 }
 0x1c5   :  { %v2012_v43 = vpop.f32.mrf.mxu1  ;;  %v2144_v13 = vpack.c.bf16 %v2084_v0, %v2080_v4  ;;  %v1900_v56 = vadd.f32 %v1899_v59, %v1787_v29  ;;  %v2011_v6 = vadd.f32 %v2010_v51, %v1898_v10  ;;  %v2087_v50 = vmax.f32 %v2009_v9, 0.0 }
 0x1c6   :  { %v1901_v19 = vpop.f32.mrf.mxu0 }
 0x1c7   :  { %v2014_v30 = vpop.f32.mrf.mxu1  ;;  %v2013_v48 = vadd.f32 %v2012_v43, %v1900_v56  ;;  %v1902_v24 = vadd.f32 %v1901_v19, %v1789_v16  ;;  %2714 = vmatprep.mubr.bf16.mxu1 %v2144_v13  ;;  %v2088_v36 = vmax.f32 %v2011_v6, 0.0  ;;  %v1809_v6 = vadd.f32 %v4155_v8, %v4085_v31 }
 0x1c8   :  { %v1905_v58 = vpop.f32.mrf.mxu0  ;;  %2715 = vmatmul.mubr.bf16.vlgmr.msra.gmra.mxu1 %v2143_v26  ;;  %v1817_v8 = vadd.f32 %v4171_v38, %v4076_v1 }
 0x1c9   :  { %v2018_v39 = vpop.f32.mrf.mxu1  ;;  %v2091_v55 = vmax.f32 %v2013_v48, 0.0  ;;  %v2015_v49 = vadd.f32 %v2014_v30, %v1902_v24  ;;  %v1906_v46 = vadd.f32 %v1905_v58, %v4126_v3 }
 0x1ca   :  { %v1907_v57 = vpop.f32.mrf.mxu0 }
 0x1cb   :  { %v2020_v2 = vpop.f32.mrf.mxu1  ;;  %v2147_v45 = vpack.c.bf16 %v2091_v55, %v2087_v50  ;;  %v2092_v53 = vmax.f32 %v2015_v49, 0.0  ;;  %v1908_v33 = vadd.f32 %v1907_v57, %v4130_v18  ;;  %v2019_v27 = vadd.f32 %v2018_v39, %v1906_v46 }
 0x1cc   :  { %v1909_v20 = vpop.f32.mrf.mxu0 }
 0x1cd   :  { %v2022_v41 = vpop.f32.mrf.mxu1  ;;  %v2148_v17 = vpack.c.bf16 %v2092_v53, %v2088_v36  ;;  %v1910_v34 = vadd.f32 %v1909_v20, %v1797_v40  ;;  %v2021_v29 = vadd.f32 %v2020_v2, %v1908_v33  ;;  %v2095_v26 = vmax.f32 %v2019_v27, 0.0 }
 0x1ce   :  { %v1911_v47 = vpop.f32.mrf.mxu0  ;;  %v1819_v27 = vadd.f32 %v4175_v25, %v4085_v31  ;;  %v1827_v25 = vadd.f32 %v4188_v52, %v4076_v1 }
 0x1cf   :  { %v2024_v3 = vpop.f32.mrf.mxu1  ;;  %v2023_v22 = vadd.f32 %v2022_v41, %v1910_v34  ;;  %v1912_v5 = vadd.f32 %v1911_v47, %v1799_v42  ;;  %2724 = vmatprep.mubr.bf16.mxu1 %v2148_v17  ;;  %v2096_v16 = vmax.f32 %v2021_v29, 0.0 }
 0x1d0   :  { %v1915_v51 = vpop.f32.mrf.mxu0  ;;  %2725 = vmatmul.mubr.bf16.gmra.mxu1 %v2147_v45 }
 0x1d1   :  { %v2028_v4 = vpop.f32.mrf.mxu1  ;;  %v2099_v0 = vmax.f32 %v2023_v22, 0.0  ;;  %v2025_v18 = vadd.f32 %v2024_v3, %v1912_v5  ;;  %v1916_v10 = vadd.f32 %v1915_v51, %v4144_v35 }
 0x1d2   :  { %v1917_v59 = vpop.f32.mrf.mxu0 }
 0x1d3   :  { %v2030_v43 = vpop.f32.mrf.mxu1  ;;  %v2151_v13 = vpack.c.bf16 %v2099_v0, %v2095_v26  ;;  %v2100_v9 = vmax.f32 %v2025_v18, 0.0  ;;  %v1918_v56 = vadd.f32 %v1917_v59, %v4148_v32  ;;  %v2029_v24 = vadd.f32 %v2028_v4, %v1916_v10 }
 0x1d4   :  { %v1919_v19 = vpop.f32.mrf.mxu0 }
 0x1d5   :  { %v2032_v30 = vpop.f32.mrf.mxu1  ;;  %v2152_v48 = vpack.c.bf16 %v2100_v9, %v2096_v16  ;;  %v1920_v58 = vadd.f32 %v1919_v19, %v1807_v37  ;;  %v2031_v50 = vadd.f32 %v2030_v43, %v1918_v56  ;;  %v2103_v40 = vmax.f32 %v2029_v24, 0.0 }
 0x1d6   :  { %v1921_v39 = vpop.f32.mrf.mxu0  ;;  %v1829_v19 = vadd.f32 %v4193_v60, %v4085_v31  ;;  %v1837_v60 = vadd.f32 %v4206_v7, %v4076_v1 }
 0x1d7   :  { %v2034_v35 = vpop.f32.mrf.mxu1  ;;  %v2033_v55 = vadd.f32 %v2032_v30, %v1920_v58  ;;  %v1922_v62 = vadd.f32 %v1921_v39, %v1809_v6  ;;  %2734 = vmatprep.mubr.bf16.mxu1 %v2152_v48  ;;  %v2104_v53 = vmax.f32 %v2031_v50, 0.0 }
 0x1d8   :  { %v1925_v49 = vpop.f32.mrf.mxu0  ;;  %2735 = vmatmul.mubr.bf16.gmra.mxu1 %v2151_v13 }
 0x1d9   :  { %v2038_v46 = vpop.f32.mrf.mxu1  ;;  %v2107_v57 = vmax.f32 %v2033_v55, 0.0  ;;  %v2035_v32 = vadd.f32 %v2034_v35, %v1922_v62  ;;  %v1926_v2 = vadd.f32 %v1925_v49, %v4164_v14 }
 0x1da   :  { %v1927_v36 = vpop.f32.mrf.mxu0 }
 0x1db   :  { %v2040_v45 = vpop.f32.mrf.mxu1  ;;  %v2155_v33 = vpack.c.bf16 %v2107_v57, %v2103_v40  ;;  %v2108_v20 = vmax.f32 %v2035_v32, 0.0  ;;  %v1928_v41 = vadd.f32 %v1927_v36, %v4169_v23  ;;  %v2039_v47 = vadd.f32 %v2038_v46, %v1926_v2 }
 0x1dc   :  { %v1929_v42 = vpop.f32.mrf.mxu0 }
 0x1dd   :  { %v2042_v17 = vpop.f32.mrf.mxu1  ;;  %v2156_v34 = vpack.c.bf16 %v2108_v20, %v2104_v53  ;;  %v1930_v3 = vadd.f32 %v1929_v42, %v1817_v8  ;;  %v2041_v22 = vadd.f32 %v2040_v45, %v1928_v41  ;;  %v2111_v26 = vmax.f32 %v2039_v47, 0.0 }
 0x1de   :  { %v1931_v29 = vpop.f32.mrf.mxu0  ;;  %v1839_v53 = vadd.f32 %v4211_v15, %v4085_v31  ;;  %v1847_v15 = vadd.f32 %v4224_v54, %v4076_v1 }
 0x1df   :  { %v2044_v14 = vpop.f32.mrf.mxu1  ;;  %v2043_v5 = vadd.f32 %v2042_v17, %v1930_v3  ;;  %v1932_v38 = vadd.f32 %v1931_v29, %v1819_v27  ;;  %2744 = vmatprep.mubr.bf16.mxu1 %v2156_v34  ;;  %v2112_v59 = vmax.f32 %v2041_v22, 0.0 }
 0x1e0   :  { %v1935_v51 = vpop.f32.mrf.mxu0  ;;  %2745 = vmatmul.mubr.bf16.gmra.mxu1 %v2155_v33 }
 0x1e1   :  { %v2048_v4 = vpop.f32.mrf.mxu1  ;;  %v2115_v0 = vmax.f32 %v2043_v5, 0.0  ;;  %v2045_v23 = vadd.f32 %v2044_v14, %v1932_v38  ;;  %v1936_v18 = vadd.f32 %v1935_v51, %v4182_v12 }
 0x1e2   :  { %v1937_v10 = vpop.f32.mrf.mxu0 }
 0x1e3   :  { %v2050_v37 = vpop.f32.mrf.mxu1  ;;  %v2159_v43 = vpack.c.bf16 %v2115_v0, %v2111_v26  ;;  %v2116_v16 = vmax.f32 %v2045_v23, 0.0  ;;  %v1938_v13 = vadd.f32 %v1937_v10, %v4186_v11  ;;  %v2049_v6 = vadd.f32 %v2048_v4, %v1936_v18 }
 0x1e4   :  { %v1939_v9 = vpop.f32.mrf.mxu0  ;;  %v1849_v18 = vadd.f32 %v4229_v21, %v4085_v31 }
 0x1e5   :  { %v2052_v56 = vpop.f32.mrf.mxu1  ;;  %v2160_v30 = vpack.c.bf16 %v2116_v16, %v2112_v59  ;;  %v1940_v48 = vadd.f32 %v1939_v9, %v1827_v25  ;;  %v2051_v58 = vadd.f32 %v2050_v37, %v1938_v13  ;;  %v2119_v55 = vmax.f32 %v2049_v6, 0.0 }
 0x1e6   :  { %v1941_v24 = vpop.f32.mrf.mxu0 }
 0x1e7   :  { %v2054_v12 = vpop.f32.mrf.mxu1  ;;  %v2053_v39 = vadd.f32 %v2052_v56, %v1940_v48  ;;  %v1942_v52 = vadd.f32 %v1941_v24, %v1829_v19  ;;  %2754 = vmatprep.mubr.bf16.mxu1 %v2160_v30  ;;  %v2120_v57 = vmax.f32 %v2051_v58, 0.0 }
 0x1e8   :  { %v1945_v35 = vpop.f32.mrf.mxu0  ;;  %2755 = vmatmul.mubr.bf16.gmra.mxu1 %v2159_v43 }
 0x1e9   :  { %v2058_v50 = vpop.f32.mrf.mxu1  ;;  %v2123_v62 = vmax.f32 %v2053_v39, 0.0  ;;  %v2055_v11 = vadd.f32 %v2054_v12, %v1942_v52  ;;  %v1946_v49 = vadd.f32 %v1945_v35, %v4200_v44 }
 0x1ea   :  { %v1947_v46 = vpop.f32.mrf.mxu0 }
 0x1eb   :  { %v2060_v40 = vpop.f32.mrf.mxu1  ;;  %v2163_v32 = vpack.c.bf16 %v2123_v62, %v2119_v55  ;;  %v2124_v2 = vmax.f32 %v2055_v11, 0.0  ;;  %v1948_v8 = vadd.f32 %v1947_v46, %v4204_v28  ;;  %v2059_v20 = vadd.f32 %v2058_v50, %v1946_v49 }
 0x1ec   :  { %v1949_v36 = vpop.f32.mrf.mxu0 }
 0x1ed   :  { %v2062_v45 = vpop.f32.mrf.mxu1  ;;  %v2164_v33 = vpack.c.bf16 %v2124_v2, %v2120_v57  ;;  %v1950_v41 = vadd.f32 %v1949_v36, %v1837_v60  ;;  %v2061_v17 = vadd.f32 %v2060_v40, %v1948_v8  ;;  %v2127_v3 = vmax.f32 %v2059_v20, 0.0  ;;  %v2237_v60 = vld [vmem:[%s4413_s4] sm:$0x3]  ;;  %v4436_v40 = vld [vmem:[#allocation16_spill] sm:$0xff] }
 0x1ee   :  { %v1951_v42 = vpop.f32.mrf.mxu0  ;;  %v4437_v57 = vsub.s32 0, %v4436_v40  ;;  %v4438_v2 = vsub.s32 1, %v4436_v40 }
 0x1ef   :  { %v2064_v44 = vpop.f32.mrf.mxu1  ;;  %v2063_v27 = vadd.f32 %v2062_v45, %v1950_v41  ;;  %v1952_v7 = vadd.f32 %v1951_v42, %v1839_v53  ;;  %2764 = vmatprep.mubr.bf16.mxu1 %v2164_v33  ;;  %v2128_v38 = vmax.f32 %v2061_v17, 0.0  ;;  %v2828_v33 = vld [vmem:[#allocation9 + $0x8] sm:$0xff] }
 0x1f0   :  { %v1955_v34 = vpop.f32.mrf.mxu0  ;;  %2765 = vmatmul.mubr.bf16.gmra.mxu1 %v2163_v32  ;;  %v4286_v32 = vrot.slane %v2237_v60, %v4437_v57  ;;  %v4290_v8 = vrot.slane %v2237_v60, %v4438_v2  ;;  %2893 = vmatprep.mubr.f32.mxu0 %v2828_v33 }
 0x1f1   :  { %v2068_v47 = vpop.f32.mrf.mxu1  ;;  %v2131_v29 = vmax.f32 %v2063_v27, 0.0  ;;  %v2065_v28 = vadd.f32 %v2064_v44, %v1952_v7  ;;  %v1956_v14 = vadd.f32 %v1955_v34, %v4218_v63 }
 0x1f2   :  { %v1957_v22 = vpop.f32.mrf.mxu0 }
 0x1f3   :  { %v2070_v5 = vpop.f32.mrf.mxu1  ;;  %v2167_v51 = vpack.c.bf16 %v2131_v29, %v2127_v3  ;;  %v2132_v4 = vmax.f32 %v2065_v28, 0.0  ;;  %v1958_v26 = vadd.f32 %v1957_v22, %v4222_v61  ;;  %v2069_v10 = vadd.f32 %v2068_v47, %v1956_v14 }
 0x1f4   :  { %v1959_v0 = vpop.f32.mrf.mxu0 }
 0x1f5   :  { %v2072_v23 = vpop.f32.mrf.mxu1  ;;  %v2168_v25 = vpack.c.bf16 %v2132_v4, %v2128_v38  ;;  %v1960_v37 = vadd.f32 %v1959_v0, %v1847_v15  ;;  %v2071_v63 = vadd.f32 %v2070_v5, %v1958_v26  ;;  %v2135_v54 = vmax.f32 %v2069_v10, 0.0 }
 0x1f6   :  { %v1961_v59 = vpop.f32.mrf.mxu0 }
 0x1f7   :  { %v2073_v43 = vadd.f32 %v2072_v23, %v1960_v37  ;;  %v1962_v16 = vadd.f32 %v1961_v59, %v1849_v18  ;;  %2774 = vmatprep.mubr.bf16.mxu1 %v2168_v25  ;;  %v2074_v1 = vpop.f32.mrf.mxu1  ;;  %v2136_v56 = vmax.f32 %v2071_v63, 0.0 }
 0x1f8   :  { %2775 = vmatmul.mubr.bf16.gmra.mxu1 %v2167_v51 }
 0x1f9   :  { %v2139_v13 = vmax.f32 %v2073_v43, 0.0  ;;  %v2075_v9 = vadd.f32 %v2074_v1, %v1962_v16 }
 0x1fb   :  { %v2171_v61 = vpack.c.bf16 %v2139_v13, %v2135_v54  ;;  %v2140_v19 = vmax.f32 %v2075_v9, 0.0 }
 0x1fd   :  { %v2172_v30 = vpack.c.bf16 %v2140_v19, %v2136_v56 }
 0x1ff   :  { %2784 = vmatprep.mubr.bf16.mxu1 %v2172_v30 }
 0x200   :  { %2785 = vmatmul.mubr.bf16.gmra.mxu1 %v2171_v61 }
 0x246   :  { %v2603_v31 = vpop.f32.mrf.mxu0 }
 0x247   :  { %v2604_v45 = vadd.f32 %v2603_v31, %v4286_v32 }
 0x248   :  { %v2605_v21 = vpop.f32.mrf.mxu0 }
 0x249   :  { %v2606_v20 = vadd.f32 %v2605_v21, %v4290_v8 }
 0x24a   :  { %v2607_v6 = vpop.f32.mrf.mxu0 }
 0x24b   :  { %v2608_v17 = vadd.f32 %v2607_v6, %v4286_v32 }
 0x24c   :  { %v2609_v48 = vpop.f32.mrf.mxu0 }
 0x24d   :  { %v2610_v34 = vadd.f32 %v2609_v48, %v4290_v8 }
 0x24e   :  { %v2613_v24 = vpop.f32.mrf.mxu0 }
 0x24f   :  { %v2614_v28 = vadd.f32 %v2613_v24, %v4286_v32 }
 0x250   :  { %v2615_v12 = vpop.f32.mrf.mxu0 }
 0x251   :  { %v2616_v22 = vadd.f32 %v2615_v12, %v4290_v8 }
 0x252   :  { %v2617_v58 = vpop.f32.mrf.mxu0 }
 0x253   :  { %v2618_v4 = vadd.f32 %v2617_v58, %v4286_v32 }
 0x254   :  { %v2619_v39 = vpop.f32.mrf.mxu0 }
 0x255   :  { %v2620_v23 = vadd.f32 %v2619_v39, %v4290_v8 }
 0x256   :  { %v2623_v52 = vpop.f32.mrf.mxu0 }
 0x257   :  { %v2624_v37 = vadd.f32 %v2623_v52, %v4286_v32 }
 0x258   :  { %v2625_v35 = vpop.f32.mrf.mxu0 }
 0x259   :  { %v2626_v43 = vadd.f32 %v2625_v35, %v4290_v8 }
 0x25a   :  { %v2627_v50 = vpop.f32.mrf.mxu0 }
 0x25b   :  { %v2628_v13 = vadd.f32 %v2627_v50, %v4286_v32 }
 0x25c   :  { %v2629_v55 = vpop.f32.mrf.mxu0 }
 0x25d   :  { %v2630_v61 = vadd.f32 %v2629_v55, %v4290_v8 }
 0x25e   :  { %v2633_v62 = vpop.f32.mrf.mxu0 }
 0x25f   :  { %v2634_v21 = vadd.f32 %v2633_v62, %v4286_v32 }
 0x260   :  { %v2635_v11 = vpop.f32.mrf.mxu0 }
 0x261   :  { %v2636_v24 = vadd.f32 %v2635_v11, %v4290_v8 }
 0x262   :  { %v2637_v49 = vpop.f32.mrf.mxu0 }
 0x263   :  { %v2638_v52 = vadd.f32 %v2637_v49, %v4286_v32 }
 0x264   :  { %v4282_v46 = vpop.f32.mrf.mxu0 }
 0x266   :  { %v4292_v36 = vpop.f32.mrf.mxu0 }
 0x268   :  { %v4298_v42 = vpop.f32.mrf.mxu0 }
 0x26a   :  { %v4306_v3 = vpop.f32.mrf.mxu0 }
 0x26c   :  { %v4314_v38 = vpop.f32.mrf.mxu0 }
 0x26e   :  { %v4322_v25 = vpop.f32.mrf.mxu0 }
 0x270   :  { %v4330_v1 = vpop.f32.mrf.mxu0 }
 0x272   :  { %v4338_v30 = vpop.f32.mrf.mxu0 }
 0x274   :  { %v2659_v58 = vpop.f32.mrf.mxu0 }
 0x276   :  { %v2663_v60 = vpop.f32.mrf.mxu0 }
 0x278   :  { %v2665_v57 = vpop.f32.mrf.mxu0 }
 0x288   :  { %v2716_v53 = vpop.f32.mrf.mxu1 }
 0x289   :  { %v4296_v41 = vadd.f32 %v2716_v53, %v2604_v45  ;;  %v2667_v45 = vpop.f32.mrf.mxu0 }
 0x28a   :  { %v2718_v44 = vpop.f32.mrf.mxu1 }
 0x28b   :  { %v4301_v27 = vadd.f32 %v2718_v44, %v2606_v20  ;;  %v2669_v20 = vpop.f32.mrf.mxu0 }
 0x28c   :  { %v2720_v7 = vpop.f32.mrf.mxu1 }
 0x28d   :  { %v4304_v47 = vadd.f32 %v2720_v7, %v2608_v17  ;;  %v2673_v17 = vpop.f32.mrf.mxu0 }
 0x28e   :  { %v2722_v29 = vpop.f32.mrf.mxu1 }
 0x28f   :  { %v4309_v14 = vadd.f32 %v2722_v29, %v2610_v34  ;;  %v2675_v29 = vpop.f32.mrf.mxu0 }
 0x290   :  { %v2726_v15 = vpop.f32.mrf.mxu1 }
 0x291   :  { %v4312_v5 = vadd.f32 %v2726_v15, %v2614_v28 }
 0x292   :  { %v2728_v51 = vpop.f32.mrf.mxu1 }
 0x293   :  { %v4317_v26 = vadd.f32 %v2728_v51, %v2616_v22  ;;  %v2677_v22 = vpop.f32.mrf.mxu0 }
 0x294   :  { %v2730_v0 = vpop.f32.mrf.mxu1 }
 0x295   :  { %v4320_v18 = vadd.f32 %v2730_v0, %v2618_v4  ;;  %v2679_v0 = vpop.f32.mrf.mxu0 }
 0x296   :  { %v2732_v10 = vpop.f32.mrf.mxu1 }
 0x297   :  { %v4325_v59 = vadd.f32 %v2732_v10, %v2620_v23  ;;  %v2678_v10 = vadd.f32 %v2677_v22, %v4286_v32  ;;  %v2668_v22 = vadd.f32 %v2667_v45, %v4286_v32  ;;  %v2658_v45 = vadd.f32 %v4338_v30, %v4286_v32 }
 0x298   :  { %v2736_v63 = vpop.f32.mrf.mxu1 }
 0x299   :  { %v4328_v16 = vadd.f32 %v2736_v63, %v2624_v37  ;;  %v2676_v63 = vadd.f32 %v2675_v29, %v4290_v8  ;;  %v2666_v29 = vadd.f32 %v2665_v57, %v4290_v8  ;;  %v2656_v57 = vadd.f32 %v4330_v1, %v4290_v8 }
 0x29a   :  { %v2738_v54 = vpop.f32.mrf.mxu1  ;;  %v2648_v1 = vadd.f32 %v4306_v3, %v4286_v32 }
 0x29b   :  { %v4333_v9 = vadd.f32 %v2738_v54, %v2626_v43  ;;  %v2680_v43 = vadd.f32 %v2679_v0, %v4290_v8 }
 0x29c   :  { %v2740_v56 = vpop.f32.mrf.mxu1 }
 0x29d   :  { %v4336_v19 = vadd.f32 %v2740_v56, %v2628_v13 }
 0x29e   :  { %v2742_v31 = vpop.f32.mrf.mxu1 }
 0x29f   :  { %v4341_v6 = vadd.f32 %v2742_v31, %v2630_v61  ;;  %v2674_v31 = vadd.f32 %v2673_v17, %v4286_v32  ;;  %v2664_v17 = vadd.f32 %v2663_v60, %v4286_v32 }
 0x2a0   :  { %v2746_v48 = vpop.f32.mrf.mxu1 }
 0x2a1   :  { %v4344_v12 = vadd.f32 %v2746_v48, %v2634_v21  ;;  %v2670_v21 = vadd.f32 %v2669_v20, %v4290_v8  ;;  %v2660_v20 = vadd.f32 %v2659_v58, %v4290_v8  ;;  %v2654_v58 = vadd.f32 %v4322_v25, %v4286_v32 }
 0x2a2   :  { %v2748_v39 = vpop.f32.mrf.mxu1 }
 0x2a3   :  { %v4347_v35 = vadd.f32 %v2748_v39, %v2636_v24 }
 0x2a4   :  { %v2750_v50 = vpop.f32.mrf.mxu1 }
 0x2a5   :  { %v4349_v55 = vadd.f32 %v2750_v50, %v2638_v52 }
 0x2a6   :  { %v4351_v40 = vpop.f32.mrf.mxu1 }
 0x2a8   :  { %v4353_v62 = vpop.f32.mrf.mxu1 }
 0x2aa   :  { %v4355_v2 = vpop.f32.mrf.mxu1 }
 0x2ac   :  { %v4357_v11 = vpop.f32.mrf.mxu1 }
 0x2ae   :  { %v2762_v53 = vpop.f32.mrf.mxu1 }
 0x2b0   :  { %v2766_v33 = vpop.f32.mrf.mxu1 }
 0x2b2   :  { %v2768_v49 = vpop.f32.mrf.mxu1 }
 0x2b4   :  { %v2770_v44 = vpop.f32.mrf.mxu1 }
 0x2b6   :  { %v2772_v7 = vpop.f32.mrf.mxu1 }
 0x2b8   :  { %v2776_v34 = vpop.f32.mrf.mxu1 }
 0x2ba   :  { %v2778_v28 = vpop.f32.mrf.mxu1 }
 0x2bc   :  { %v2780_v15 = vpop.f32.mrf.mxu1 }
 0x2bd   :  { %v2781_v0 = vadd.f32 %v2780_v15, %v2668_v22 }
 0x2be   :  { %v2782_v51 = vpop.f32.mrf.mxu1 }
 0x2bf   :  { %v2783_v52 = vadd.f32 %v2782_v51, %v2670_v21  ;;  %v2821_v51 = vmax.f32 %v2781_v0, 0.0 }
 0x2c0   :  { %v2786_v4 = vpop.f32.mrf.mxu1 }
 0x2c1   :  { %v2787_v24 = vadd.f32 %v2786_v4, %v2674_v31  ;;  %v2777_v4 = vadd.f32 %v2776_v34, %v2664_v17  ;;  %v2767_v34 = vadd.f32 %v2766_v33, %v2654_v58 }
 0x2c2   :  { %v2788_v23 = vpop.f32.mrf.mxu1 }
 0x2c3   :  { %v2789_v56 = vadd.f32 %v2788_v23, %v2676_v63  ;;  %v2779_v23 = vadd.f32 %v2778_v28, %v2666_v29  ;;  %v2773_v63 = vadd.f32 %v2772_v7, %v2660_v20  ;;  %v2771_v28 = vadd.f32 %v2770_v44, %v2658_v45 }
 0x2c4   :  { %v2790_v37 = vpop.f32.mrf.mxu1  ;;  %v2819_v15 = vmax.f32 %v2777_v4, 0.0  ;;  %v2650_v7 = vadd.f32 %v4314_v38, %v4290_v8  ;;  %v2761_v44 = vadd.f32 %v4357_v11, %v2648_v1  ;;  %v2815_v25 = vmax.f32 %v2767_v34, 0.0 }
 0x2c5   :  { %v2791_v54 = vadd.f32 %v2790_v37, %v2678_v10  ;;  %v2824_v50 = vmax.f32 %v2789_v56, 0.0  ;;  %v2823_v10 = vmax.f32 %v2787_v24, 0.0  ;;  %v2822_v37 = vmax.f32 %v2783_v52, 0.0 }
 0x2c6   :  { %v2792_v13 = vpop.f32.mrf.mxu1  ;;  %v2818_v60 = vmax.f32 %v2773_v63, 0.0  ;;  %v2763_v30 = vadd.f32 %v2762_v53, %v2650_v7  ;;  %v2644_v38 = vadd.f32 %v4292_v36, %v4286_v32  ;;  %v2640_v53 = vadd.f32 %v4282_v46, %v4290_v8 }
 0x2c7   :  { %v2793_v61 = vadd.f32 %v2792_v13, %v2680_v43  ;;  %v2825_v39 = vmax.f32 %v2791_v54, 0.0  ;;  %v2820_v43 = vmax.f32 %v2779_v23, 0.0  ;;  %v2769_v54 = vadd.f32 %v2768_v49, %v2656_v57 }
 0x2c8   :  { %v2817_v13 = vmax.f32 %v2771_v28, 0.0  ;;  %v2646_v49 = vadd.f32 %v4298_v42, %v4290_v8  ;;  %v2814_v31 = vmax.f32 %v2763_v30, 0.0  ;;  %v2757_v3 = vadd.f32 %v4353_v62, %v2644_v38 }
 0x2c9   :  { %v2826_v48 = vmax.f32 %v2793_v61, 0.0  ;;  %v2816_v56 = vmax.f32 %v2769_v54, 0.0  ;;  %v2813_v33 = vmax.f32 %v2761_v44, 0.0  ;;  %v2753_v42 = vadd.f32 %v4351_v40, %v2640_v53 }
 0x2ca   :  { %v2759_v61 = vadd.f32 %v4355_v2, %v2646_v49  ;;  %v2811_v11 = vmax.f32 %v2757_v3, 0.0  ;;  %v2809_v2 = vmax.f32 %v4349_v55, 0.0  ;;  %v2808_v32 = vmax.f32 %v4347_v35, 0.0 }
 0x2cb   :  { %2829 = vmatprep.subr.mxu0 %v2826_v48  ;;  %v2810_v48 = vmax.f32 %v2753_v42, 0.0  ;;  %v2807_v46 = vmax.f32 %v4344_v12, 0.0  ;;  %v2806_v8 = vmax.f32 %v4341_v6, 0.0  ;;  %v2805_v36 = vmax.f32 %v4336_v19, 0.0 }
 0x2cc   :  { %2830 = vmatpush1.xpose.msra.mxu0 %v2825_v39  ;;  %v2812_v21 = vmax.f32 %v2759_v61, 0.0  ;;  %v2804_v40 = vmax.f32 %v4333_v9, 0.0  ;;  %v2803_v62 = vmax.f32 %v4328_v16, 0.0  ;;  %v2802_v55 = vmax.f32 %v4325_v59, 0.0 }
 0x2cd   :  { %2831 = vmatprep.subr.mxu0 %v2824_v50  ;;  %v2801_v35 = vmax.f32 %v4320_v18, 0.0  ;;  %v2800_v12 = vmax.f32 %v4317_v26, 0.0  ;;  %v2799_v6 = vmax.f32 %v4312_v5, 0.0  ;;  %v2798_v19 = vmax.f32 %v4309_v14, 0.0  ;;  %v2827_v18 = vld [vmem:[#allocation9] sm:$0xff] }
 0x2ce   :  { %v2797_v9 = vmax.f32 %v4304_v47, 0.0  ;;  %v2796_v16 = vmax.f32 %v4301_v27, 0.0  ;;  %v2795_v59 = vmax.f32 %v4296_v41, 0.0  ;;  %v2900_v26 = vstv %s4415_s6 }
 0x2d0   :  { %2832 = vmatpush1.xpose.msra.mxu0 %v2823_v10 }
 0x2d1   :  { %2833 = vmatprep.subr.mxu0 %v2822_v37 }
 0x2d4   :  { %2834 = vmatpush1.xpose.msra.mxu0 %v2821_v51 }
 0x2d5   :  { %2835 = vmatprep.subr.mxu0 %v2820_v43 }
 0x2d8   :  { %2836 = vmatpush1.xpose.msra.mxu0 %v2819_v15 }
 0x2d9   :  { %2837 = vmatprep.subr.mxu0 %v2818_v60 }
 0x2dc   :  { %2838 = vmatpush1.xpose.msra.mxu0 %v2817_v13 }
 0x2dd   :  { %2839 = vmatprep.subr.mxu0 %v2816_v56 }
 0x2e0   :  { %2840 = vmatpush1.xpose.msra.mxu0 %v2815_v25 }
 0x2e1   :  { %2841 = vmatprep.subr.mxu0 %v2814_v31 }
 0x2e4   :  { %2842 = vmatpush1.xpose.msra.mxu0 %v2813_v33 }
 0x2e5   :  { %2843 = vmatprep.subr.mxu0 %v2812_v21 }
 0x2e8   :  { %2844 = vmatpush1.xpose.msra.mxu0 %v2811_v11 }
 0x2e9   :  { %2845 = vmatprep.subr.mxu0 %v2810_v48 }
 0x2ec   :  { %2846 = vmatpush1.xpose.msra.mxu0 %v2809_v2 }
 0x2ed   :  { %2847 = vmatprep.subr.mxu0 %v2808_v32 }
 0x2f0   :  { %2848 = vmatpush1.xpose.msra.mxu0 %v2807_v46 }
 0x2f1   :  { %2849 = vmatprep.subr.mxu0 %v2806_v8 }
 0x2f4   :  { %2850 = vmatpush1.xpose.msra.mxu0 %v2805_v36 }
 0x2f5   :  { %2851 = vmatprep.subr.mxu0 %v2804_v40 }
 0x2f8   :  { %2852 = vmatpush1.xpose.msra.mxu0 %v2803_v62 }
 0x2f9   :  { %2853 = vmatprep.subr.mxu0 %v2802_v55 }
 0x2fc   :  { %2854 = vmatpush1.xpose.msra.mxu0 %v2801_v35 }
 0x2fd   :  { %2855 = vmatprep.subr.mxu0 %v2800_v12 }
 0x300   :  { %2856 = vmatpush1.xpose.msra.mxu0 %v2799_v6 }
 0x301   :  { %2857 = vmatprep.subr.mxu0 %v2798_v19 }
 0x304   :  { %2858 = vmatpush1.xpose.msra.mxu0 %v2797_v9 }
 0x305   :  { %2859 = vmatprep.subr.mxu0 %v2796_v16 }
 0x308   :  { %2860 = vmatpush1.xpose.msra.mxu0 %v2795_v59 }
 0x30b   :  { %2894 = vmatmul.mubr.f32.vlgmr.msra.gmra.mxu0 %v2827_v18 }
 0x3cb   :  { %v2895_v5 = vpop.f32.mrf.mxu0 }
 0x3cc   :  { %v2901_v24 = vadd.f32 %v2900_v26, %v2895_v5 }
 0x3cd   :  { %v2897_v14 = vpop.f32.mrf.mxu0 }
 0x3ce   :  { %v3182_v39 = vmul.f32 -1.442695, %v2901_v24 }
 0x3d0   :  { %3578 = vpow2.f32 %v3182_v39 }
 0x3dd   :  { %v3579_v52 = vpop.eup %3578 }
 0x3de   :  { %v2905_v47 = vadd.f32 1.0, %v3579_v52 }
 0x3e0   :  { %3580 = vrcp.f32 %v2905_v47 }
 0x3ed   :  { %v3581_v27 = vpop.eup %3580 }
 0x3ee   :  { %2908 = vst [vmem:[#allocation11] sm:$0x1] %v3581_v27 }
 0x3ef   :  { %3673 = shalt.err (!%p3670_p10)
}
 0x3f0   :  { %2918 = dma.vmem_to_hbm [thread:$0]  %s2916_s28, 16, %s4416_s7, [#allocation5]  }
 0x3f1   :  { %3688 = dma.done.wait [#allocation5], 16  }
 0x3f2   :  { %3689 = vsyncadd [#allocation5], 4294967280 }
 0x3f3   :  { %2922 = vsyncpa [#allocation4], 1 }
 0x3f4   :  { %2923 = vsyncpa [#allocation7], 1 }
 0x3f5   :  { %2924 = vsyncpa [#allocation10], 1 }
 0x3f6   :  { %2925 = vsyncpa [#allocation5], 1 }

</bundles_post_ra>
